<compile_context>
chip_gen: v5e
topology: v5e:2x2
jax: 0.10.0
libtpu: 0.0.40
codegen_flags: <defaults>
</compile_context>

<pallas_src>
import jax
import jax.numpy as jnp
from jax.experimental import pallas as pl
from jax.experimental.pallas import tpu as pltpu

# ----------------------------------------------------------------------------
# Model dimensions (small / synthetic but consistent with the module)
# ----------------------------------------------------------------------------
B       = 2      # batch
T_VID   = 8      # video feature tokens per sample (vision encoder seq len)
S       = 24     # text sequence length
DV      = 768    # Timesformer hidden size (fixed by Linear(768, ...))
H       = 512    # scaled-down LLM hidden size (stands in for SmolLM2's 576)
VOCAB   = 64     # tiny synthetic vocab (after add_special_tokens / resize)
VIDEO_TOKEN_ID = VOCAB - 1   # the added '<video>' token id
LN_EPS  = 1e-5


# ----------------------------------------------------------------------------
# Fused kernel: adapter (Linear+GELU+LN) + embedding lookup + masked merge
# ----------------------------------------------------------------------------
def _fused_kernel(ids_ref, slot_ref, vf_ref, w_ref, b_ref, g_ref, beta_ref,
                  emb_ref, o_ref):
    nt = ids_ref.shape[0]          # B*S   text positions
    nv = vf_ref.shape[0]           # B*T_VID video rows
    vocab = emb_ref.shape[0]

    # --- 1. video adapter: Linear (bf16 x bf16 -> f32 acc) + GELU(erf) + LN ---
    x = vf_ref[...].astype(jnp.bfloat16)                              # (nv, DV)
    y = jnp.dot(x, w_ref[...], preferred_element_type=jnp.float32)    # (nv, H)
    y = y + b_ref[...]
    # exact (erf) GELU, matching torch.nn.GELU() default -- kept in f32
    y = 0.5 * y * (1.0 + jax.lax.erf(y * jnp.float32(0.7071067811865476)))
    mean = jnp.mean(y, axis=-1, keepdims=True)
    var = jnp.mean(jnp.square(y - mean), axis=-1, keepdims=True)
    y = (y - mean) * jax.lax.rsqrt(var + LN_EPS)
    video_emb = (y * g_ref[...] + beta_ref[...]).astype(jnp.bfloat16)  # (nv, H)
    # TODO(synk): Dropout(0.1) is identity in eval mode; training-mode RNG mask
    # (pltpu.prng_seed / prng_random_bits) not wired up here.

    # --- 2. text embeddings: exact gather via one-hot @ bf16 table (MXU) ------
    ids = ids_ref[...]                                              # (nt,1) i32
    text_onehot = (ids == jax.lax.broadcasted_iota(jnp.int32, (nt, vocab), 1)
                   ).astype(jnp.bfloat16)                           # (nt, vocab)
    text_emb = jnp.dot(text_onehot, emb_ref[...],
                       preferred_element_type=jnp.float32)          # (nt, H)

    # --- 3. placement: k-th video row -> k-th True mask position -------------
    slot = slot_ref[...]                                 # (nt,1), -1 = not video
    place_onehot = (slot == jax.lax.broadcasted_iota(jnp.int32, (nt, nv), 1)
                    ).astype(jnp.bfloat16)                          # (nt, nv)
    video_placed = jnp.dot(place_onehot, video_emb,
                           preferred_element_type=jnp.float32)      # (nt, H)

    # masked merge: text_emb[video_mask] = video_emb
    o_ref[...] = jnp.where(slot >= 0, video_placed, text_emb).astype(o_ref.dtype)


def fused_vlm_embed(params, video_features, input_ids):
    """Produce fused inputs_embeds (B, S, H) bf16 in a single pallas_call."""
    nv = B * T_VID
    nt = B * S

    flat_ids = input_ids.reshape(nt).astype(jnp.int32)
    flat_mask = flat_ids == VIDEO_TOKEN_ID
    # k-th True position (row-major over (B,S)) receives video_emb row k, which
    # replicates torch's `text_emb[video_mask] = video_emb` ordering.
    # NOTE: PyTorch raises on a count mismatch; here a mismatch would silently
    # place zeros / drop rows -- caller must ensure mask.sum() == B*T_VID
    # (asserted in __main__).
    slot = jnp.where(flat_mask,
                     jnp.cumsum(flat_mask.astype(jnp.int32)) - 1,
                     -1).astype(jnp.int32)

    out = pl.pallas_call(
        _fused_kernel,
        out_shape=jax.ShapeDtypeStruct((nt, H), jnp.bfloat16),
        grid_spec=pltpu.PrefetchScalarGridSpec(
            num_scalar_prefetch=0,
            grid=(1,),                      # whole problem in one VMEM step
            in_specs=[
                pl.BlockSpec((nt, 1), lambda i: (0, 0)),      # input ids
                pl.BlockSpec((nt, 1), lambda i: (0, 0)),      # video slot / -1
                pl.BlockSpec((nv, DV), lambda i: (0, 0)),     # video features
                pl.BlockSpec((DV, H), lambda i: (0, 0)),      # adapter W (bf16)
                pl.BlockSpec((1, H), lambda i: (0, 0)),       # adapter bias
                pl.BlockSpec((1, H), lambda i: (0, 0)),       # LN gamma
                pl.BlockSpec((1, H), lambda i: (0, 0)),       # LN beta
                pl.BlockSpec((VOCAB, H), lambda i: (0, 0)),   # embedding table
            ],
            out_specs=pl.BlockSpec((nt, H), lambda i: (0, 0)),
        ),
        compiler_params=pltpu.CompilerParams(
            dimension_semantics=("arbitrary",)),
    )(
        flat_ids.reshape(nt, 1),
        slot.reshape(nt, 1),
        video_features.reshape(nv, DV),
        params["adapter_w"],
        params["adapter_b"].reshape(1, H),
        params["ln_gamma"].reshape(1, H),
        params["ln_beta"].reshape(1, H),
        params["emb_table"],
    )
    return out.reshape(B, S, H)


# ----------------------------------------------------------------------------
# Forward pass
# ----------------------------------------------------------------------------
def sport_vlm_forward(params, video_features, input_ids, attention_mask, labels):
    # TODO(synk): pretrained Timesformer vision encoder is not reproducible here;
    # `video_features` stands in for vision_encoder(**inputs).last_hidden_state.
    fused = fused_vlm_embed(params, video_features, input_ids)   # (B,S,H) bf16
    # TODO(synk): frozen SmolLM2 + LoRA causal-LM forward (logits/loss) is a
    # full pretrained transformer and is not re-implemented here.
    del attention_mask, labels
    return fused


# ----------------------------------------------------------------------------
# Deterministic parameter / input construction
# ----------------------------------------------------------------------------
def make_params(key):
    k1, k2 = jax.random.split(key, 2)
    return {
        # bf16-stored adapter weight: halves the dominant HBM DMA, native MXU
        # input dtype on all generations; the dot accumulates in f32.
        "adapter_w": (jax.random.normal(k1, (DV, H), jnp.float32) * 0.02
                      ).astype(jnp.bfloat16),
        "adapter_b": jnp.zeros((H,), jnp.float32),
        "ln_gamma": jnp.ones((H,), jnp.float32),
        "ln_beta": jnp.zeros((H,), jnp.float32),
        "emb_table": (jax.random.normal(k2, (VOCAB, H), jnp.float32) * 0.02
                      ).astype(jnp.bfloat16),
    }


if __name__ == "__main__":
    key = jax.random.PRNGKey(0)
    kp, kv, kt = jax.random.split(key, 3)

    params = make_params(kp)

    # Synthetic vision-encoder output features.
    video_features = jax.random.normal(kv, (B, T_VID, DV), jnp.float32)

    # input_ids with exactly T_VID '<video>' tokens per sample (positions 1..T_VID).
    input_ids = jax.random.randint(kt, (B, S), 0, VOCAB - 1, dtype=jnp.int32)
    input_ids = input_ids.at[:, 1:1 + T_VID].set(VIDEO_TOKEN_ID)
    attention_mask = jnp.ones((B, S), jnp.int32)
    labels = input_ids

    # PyTorch's `text_emb[video_mask] = video_emb` raises on a count mismatch;
    # enforce the same invariant explicitly here.
    assert int(jnp.sum(input_ids == VIDEO_TOKEN_ID)) == B * T_VID

    out = sport_vlm_forward(params, video_features, input_ids,
                            attention_mask, labels)
    out = jax.block_until_ready(out)
    assert out.shape == (B, S, H) and out.dtype == jnp.bfloat16
    print("KERNEL_OK")
</pallas_src>

<mosaic_0001>
module attributes {stable_mosaic.version = 11 : i64} {
  func.func @_fused_kernel(%arg0: i32, %arg1: memref<48x1xi32, #tpu.memory_space<vmem>>, %arg2: memref<48x1xi32, #tpu.memory_space<vmem>>, %arg3: memref<16x768xf32, #tpu.memory_space<vmem>>, %arg4: memref<768x512xbf16, #tpu.memory_space<vmem>>, %arg5: memref<1x512xf32, #tpu.memory_space<vmem>>, %arg6: memref<1x512xf32, #tpu.memory_space<vmem>>, %arg7: memref<1x512xf32, #tpu.memory_space<vmem>>, %arg8: memref<64x512xbf16, #tpu.memory_space<vmem>>, %arg9: memref<48x512xbf16, #tpu.memory_space<vmem>>) attributes {dimension_semantics = [#tpu.dimension_semantics<arbitrary>], iteration_bounds = array<i64: 1>, scalar_prefetch = 0 : i64, scratch_operands = 0 : i64, tpu.core_type = #tpu.core_type<tc>, window_params = [{pipeline_mode = #tpu.pipeline_mode<synchronous>, transform_indices = @transform_0, window_bounds = array<i64: 48, 1>}, {pipeline_mode = #tpu.pipeline_mode<synchronous>, transform_indices = @transform_1, window_bounds = array<i64: 48, 1>}, {pipeline_mode = #tpu.pipeline_mode<synchronous>, transform_indices = @transform_2, window_bounds = array<i64: 16, 768>}, {pipeline_mode = #tpu.pipeline_mode<synchronous>, transform_indices = @transform_3, window_bounds = array<i64: 768, 512>}, {pipeline_mode = #tpu.pipeline_mode<synchronous>, transform_indices = @transform_4, window_bounds = array<i64: 1, 512>}, {pipeline_mode = #tpu.pipeline_mode<synchronous>, transform_indices = @transform_5, window_bounds = array<i64: 1, 512>}, {pipeline_mode = #tpu.pipeline_mode<synchronous>, transform_indices = @transform_6, window_bounds = array<i64: 1, 512>}, {pipeline_mode = #tpu.pipeline_mode<synchronous>, transform_indices = @transform_7, window_bounds = array<i64: 64, 512>}, {pipeline_mode = #tpu.pipeline_mode<synchronous>, transform_indices = @transform_8, window_bounds = array<i64: 48, 512>}]} {
    %c0 = arith.constant 0 : index
    %c0_0 = arith.constant 0 : index
    %0 = vector.load %arg3[%c0, %c0_0] : memref<16x768xf32, #tpu.memory_space<vmem>>, vector<16x768xf32>
    %1 = arith.truncf %0 : vector<16x768xf32> to vector<16x768xbf16>
    %c0_1 = arith.constant 0 : index
    %c0_2 = arith.constant 0 : index
    %2 = vector.load %arg4[%c0_1, %c0_2] : memref<768x512xbf16, #tpu.memory_space<vmem>>, vector<768x512xbf16>
    %cst = arith.constant dense<0.000000e+00> : vector<16x512xf32>
    %3 = tpu.matmul %1, %2, %cst {dimension_numbers = #tpu.dot_dimension_numbers<[1], [0], [0], [1], [0, 0, 1, 1], [], []>} : vector<16x768xbf16>, vector<768x512xbf16>, vector<16x512xf32> -> vector<16x512xf32>
    %c0_3 = arith.constant 0 : index
    %c0_4 = arith.constant 0 : index
    %4 = vector.load %arg5[%c0_3, %c0_4] : memref<1x512xf32, #tpu.memory_space<vmem>>, vector<1x512xf32>
    %5 = vector.broadcast %4 : vector<1x512xf32> to vector<16x512xf32>
    %6 = arith.addf %3, %5 : vector<16x512xf32>
    %cst_5 = arith.constant 5.000000e-01 : f32
    %7 = vector.broadcast %cst_5 : f32 to vector<16x512xf32>
    %8 = arith.mulf %7, %6 : vector<16x512xf32>
    %cst_6 = arith.constant 0.707106769 : f32
    %9 = vector.broadcast %cst_6 : f32 to vector<16x512xf32>
    %10 = arith.mulf %6, %9 : vector<16x512xf32>
    %11 = math.erf %10 : vector<16x512xf32>
    %cst_7 = arith.constant 1.000000e+00 : f32
    %12 = vector.broadcast %cst_7 : f32 to vector<16x512xf32>
    %13 = arith.addf %12, %11 : vector<16x512xf32>
    %14 = arith.mulf %8, %13 : vector<16x512xf32>
    %cst_8 = arith.constant dense<0.000000e+00> : vector<16xf32>
    %15 = vector.multi_reduction <add>, %14, %cst_8 [1] : vector<16x512xf32> to vector<16xf32>
    %16 = vector.shape_cast %15 : vector<16xf32> to vector<16x1xf32>
    %cst_9 = arith.constant 5.120000e+02 : f32
    %17 = vector.broadcast %cst_9 : f32 to vector<16x1xf32>
    %18 = arith.divf %16, %17 : vector<16x1xf32>
    %19 = vector.broadcast %18 : vector<16x1xf32> to vector<16x512xf32>
    %20 = arith.subf %14, %19 : vector<16x512xf32>
    %21 = arith.mulf %20, %20 : vector<16x512xf32>
    %cst_10 = arith.constant dense<0.000000e+00> : vector<16xf32>
    %22 = vector.multi_reduction <add>, %21, %cst_10 [1] : vector<16x512xf32> to vector<16xf32>
    %23 = vector.shape_cast %22 : vector<16xf32> to vector<16x1xf32>
    %cst_11 = arith.constant 5.120000e+02 : f32
    %24 = vector.broadcast %cst_11 : f32 to vector<16x1xf32>
    %25 = arith.divf %23, %24 : vector<16x1xf32>
    %26 = vector.broadcast %18 : vector<16x1xf32> to vector<16x512xf32>
    %27 = arith.subf %14, %26 : vector<16x512xf32>
    %cst_12 = arith.constant 9.99999974E-6 : f32
    %28 = vector.broadcast %cst_12 : f32 to vector<16x1xf32>
    %29 = arith.addf %25, %28 : vector<16x1xf32>
    %30 = math.rsqrt %29 : vector<16x1xf32>
    %31 = vector.broadcast %30 : vector<16x1xf32> to vector<16x512xf32>
    %32 = arith.mulf %27, %31 : vector<16x512xf32>
    %c0_13 = arith.constant 0 : index
    %c0_14 = arith.constant 0 : index
    %33 = vector.load %arg6[%c0_13, %c0_14] : memref<1x512xf32, #tpu.memory_space<vmem>>, vector<1x512xf32>
    %34 = vector.broadcast %33 : vector<1x512xf32> to vector<16x512xf32>
    %35 = arith.mulf %32, %34 : vector<16x512xf32>
    %c0_15 = arith.constant 0 : index
    %c0_16 = arith.constant 0 : index
    %36 = vector.load %arg7[%c0_15, %c0_16] : memref<1x512xf32, #tpu.memory_space<vmem>>, vector<1x512xf32>
    %37 = vector.broadcast %36 : vector<1x512xf32> to vector<16x512xf32>
    %38 = arith.addf %35, %37 : vector<16x512xf32>
    %39 = arith.truncf %38 : vector<16x512xf32> to vector<16x512xbf16>
    %c0_17 = arith.constant 0 : index
    %c0_18 = arith.constant 0 : index
    %40 = vector.load %arg1[%c0_17, %c0_18] : memref<48x1xi32, #tpu.memory_space<vmem>>, vector<48x1xi32>
    %41 = tpu.iota {dimensions = array<i32: 1>} : vector<48x64xi32>
    %42 = vector.broadcast %40 : vector<48x1xi32> to vector<48x64xi32>
    %43 = arith.cmpi eq, %42, %41 : vector<48x64xi32>
    %44 = arith.extui %43 : vector<48x64xi1> to vector<48x64xi32>
    %45 = arith.sitofp %44 : vector<48x64xi32> to vector<48x64xf32>
    %46 = arith.truncf %45 : vector<48x64xf32> to vector<48x64xbf16>
    %c0_19 = arith.constant 0 : index
    %c0_20 = arith.constant 0 : index
    %47 = vector.load %arg8[%c0_19, %c0_20] : memref<64x512xbf16, #tpu.memory_space<vmem>>, vector<64x512xbf16>
    %cst_21 = arith.constant dense<0.000000e+00> : vector<48x512xf32>
    %48 = tpu.matmul %46, %47, %cst_21 {dimension_numbers = #tpu.dot_dimension_numbers<[1], [0], [0], [1], [0, 0, 1, 1], [], []>} : vector<48x64xbf16>, vector<64x512xbf16>, vector<48x512xf32> -> vector<48x512xf32>
    %c0_22 = arith.constant 0 : index
    %c0_23 = arith.constant 0 : index
    %49 = vector.load %arg2[%c0_22, %c0_23] : memref<48x1xi32, #tpu.memory_space<vmem>>, vector<48x1xi32>
    %50 = tpu.iota {dimensions = array<i32: 1>} : vector<48x16xi32>
    %51 = vector.broadcast %49 : vector<48x1xi32> to vector<48x16xi32>
    %52 = arith.cmpi eq, %51, %50 : vector<48x16xi32>
    %53 = arith.extui %52 : vector<48x16xi1> to vector<48x16xi32>
    %54 = arith.sitofp %53 : vector<48x16xi32> to vector<48x16xf32>
    %55 = arith.truncf %54 : vector<48x16xf32> to vector<48x16xbf16>
    %cst_24 = arith.constant dense<0.000000e+00> : vector<48x512xf32>
    %56 = tpu.matmul %55, %39, %cst_24 {dimension_numbers = #tpu.dot_dimension_numbers<[1], [0], [0], [1], [0, 0, 1, 1], [], []>} : vector<48x16xbf16>, vector<16x512xbf16>, vector<48x512xf32> -> vector<48x512xf32>
    %c0_i32 = arith.constant 0 : i32
    %57 = vector.broadcast %c0_i32 : i32 to vector<48x1xi32>
    %58 = arith.cmpi sge, %49, %57 : vector<48x1xi32>
    %59 = vector.shape_cast %58 : vector<48x1xi1> to vector<48x1xi1>
    %60 = vector.broadcast %59 : vector<48x1xi1> to vector<48x512xi1>
    %61 = arith.select %60, %56, %48 : vector<48x512xi1>, vector<48x512xf32>
    %62 = arith.truncf %61 : vector<48x512xf32> to vector<48x512xbf16>
    %c0_25 = arith.constant 0 : index
    %c0_26 = arith.constant 0 : index
    %63 = vector.load %arg9[%c0_25, %c0_26] : memref<48x512xbf16, #tpu.memory_space<vmem>>, vector<48x512xbf16>
    tpu.vector_store %arg9[%c0_25, %c0_26], %62 {strides = array<i32>} : memref<48x512xbf16, #tpu.memory_space<vmem>>, vector<48x512xbf16>,
    return
  }
  func.func @transform_0(%arg0: i32) -> (i32, i32) {
    %c0_i32 = arith.constant 0 : i32
    %c0_i32_0 = arith.constant 0 : i32
    %c0_i32_1 = arith.constant 0 : i32
    return %c0_i32, %c0_i32_0 : i32, i32
  }
  func.func @transform_1(%arg0: i32) -> (i32, i32) {
    %c0_i32 = arith.constant 0 : i32
    %c0_i32_0 = arith.constant 0 : i32
    %c0_i32_1 = arith.constant 0 : i32
    return %c0_i32, %c0_i32_0 : i32, i32
  }
  func.func @transform_2(%arg0: i32) -> (i32, i32) {
    %c0_i32 = arith.constant 0 : i32
    %c0_i32_0 = arith.constant 0 : i32
    %c0_i32_1 = arith.constant 0 : i32
    return %c0_i32, %c0_i32_0 : i32, i32
  }
  func.func @transform_3(%arg0: i32) -> (i32, i32) {
    %c0_i32 = arith.constant 0 : i32
    %c0_i32_0 = arith.constant 0 : i32
    %c0_i32_1 = arith.constant 0 : i32
    return %c0_i32, %c0_i32_0 : i32, i32
  }
  func.func @transform_4(%arg0: i32) -> (i32, i32) {
    %c0_i32 = arith.constant 0 : i32
    %c0_i32_0 = arith.constant 0 : i32
    %c0_i32_1 = arith.constant 0 : i32
    return %c0_i32, %c0_i32_0 : i32, i32
  }
  func.func @transform_5(%arg0: i32) -> (i32, i32) {
    %c0_i32 = arith.constant 0 : i32
    %c0_i32_0 = arith.constant 0 : i32
    %c0_i32_1 = arith.constant 0 : i32
    return %c0_i32, %c0_i32_0 : i32, i32
  }
  func.func @transform_6(%arg0: i32) -> (i32, i32) {
    %c0_i32 = arith.constant 0 : i32
    %c0_i32_0 = arith.constant 0 : i32
    %c0_i32_1 = arith.constant 0 : i32
    return %c0_i32, %c0_i32_0 : i32, i32
  }
  func.func @transform_7(%arg0: i32) -> (i32, i32) {
    %c0_i32 = arith.constant 0 : i32
    %c0_i32_0 = arith.constant 0 : i32
    %c0_i32_1 = arith.constant 0 : i32
    return %c0_i32, %c0_i32_0 : i32, i32
  }
  func.func @transform_8(%arg0: i32) -> (i32, i32) {
    %c0_i32 = arith.constant 0 : i32
    %c0_i32_0 = arith.constant 0 : i32
    %c0_i32_1 = arith.constant 0 : i32
    return %c0_i32, %c0_i32_0 : i32, i32
  }
}

</mosaic_0001>

<bundles_post_ra>
// kernel: tpu_custom_call.1
= control target key start
LH: loop header
LB: loop body
LE: loop exit
PB: predicated region body
PF: predicated region fallthrough
CT: control target
= control target key end

     0   :  { %13 = vsyncpa [#allocation3], 0  ;;  %s4571_s0 = inlined_call_operand.vmem [shape: s32[48,1], index: 0, kind: input, shape index: {}]   ;;  %s4572_s1 = inlined_call_operand.vmem [shape: s32[48,1], index: 1, kind: input, shape index: {}]   ;;  %s4573_s2 = inlined_call_operand.vmem [shape: f32[16,768], index: 2, kind: input, shape index: {}]   ;;  %s4574_s3 = inlined_call_operand.hbm [shape: bf16[768,512], index: 3, kind: input, shape index: {}]   ;;  %s4575_s4 = inlined_call_operand.vmem [shape: f32[1,512], index: 4, kind: input, shape index: {}]   ;;  %s4576_s5 = inlined_call_operand.hbm [shape: f32[1,512], index: 5, kind: input, shape index: {}]   ;;  %s4577_s6 = inlined_call_operand.hbm [shape: f32[1,512], index: 6, kind: input, shape index: {}]   ;;  %s4578_s7 = inlined_call_operand.hbm [shape: bf16[64,512], index: 7, kind: input, shape index: {}]   ;;  %s4579_s8 = inlined_call_operand.hbm [shape: bf16[48,512], index: 8, kind: output, shape index: {}]  }
   0x1   :  { %14 = vsyncpa [#allocation6], 0 }
   0x2   :  { %15 = vsyncpa [#allocation9], 0  ;;  %s43_s29 = sshll.u32 %s4576_s5, 4  ;;  %s44_s29 = int_to_ptr.hbm [resolvable:$true] %s43_s29 }
   0x3   :  { %16 = vsyncpa [#allocation4], 0  ;;  %s3827_s30 = smov [#allocation5]   ;;  %s27_s12 = sshll.u32 %s4574_s3, 4  ;;  %s28_s12 = int_to_ptr.hbm [resolvable:$true] %s27_s12 }
   0x4   :  { %s45_s9 = sshll.u32 %s3827_s30, 4  ;;  %s3828_s13 = smov [#allocation2]   ;;  %s46_s9 = int_to_ptr.vmem [resolvable:$true] %s45_s9 }
   0x5   :  { %48 = dma.hbm_to_vmem [thread:$0]  %s44_s29, 64, %s46_s9, [#allocation6]  }
   0x6   :  { %s29_s14 = sshll.u32 %s3828_s13, 4  ;;  %s3829_s15 = smov 256   ;;  %s30_s14 = int_to_ptr.vmem [resolvable:$true] %s29_s14 }
   0x7   :  { %s3830_s16 = smov 16   ;;  %s54_s18 = sshll.u32 %s4577_s6, 4  ;;  %s55_s18 = int_to_ptr.hbm [resolvable:$true] %s54_s18 }
   0x8   :  { %35 = dma.hbm_to_vmem [thread:$0]  %s28_s12, 24576, %s30_s14, [#allocation3], %s3829_s15, %s3829_s15, %s3830_s16  }
   0x9   :  { %s3831_s19 = smov [#allocation7]   ;;  %s64_s22 = sshll.u32 %s4578_s7, 4  ;;  %s65_s22 = int_to_ptr.hbm [resolvable:$true] %s64_s22 }
   0xa   :  { %s56_s20 = sshll.u32 %s3831_s19, 4  ;;  %s3832_s23 = smov [#allocation8]   ;;  %s57_s20 = int_to_ptr.vmem [resolvable:$true] %s56_s20 }
   0xb   :  { %59 = dma.hbm_to_vmem [thread:$0]  %s55_s18, 64, %s57_s20, [#allocation6]  }
   0xc   :  { %s66_s24 = sshll.u32 %s3832_s23, 4  ;;  %s67_s24 = int_to_ptr.vmem [resolvable:$true] %s66_s24 }
   0xd   :  { %72 = dma.hbm_to_vmem [thread:$0]  %s65_s22, 2048, %s67_s24, [#allocation9], %s3829_s15, %s3829_s15, %s3830_s16  }
   0xe   :  { %3819 = dma.done.wait [#allocation3], 24576  }
   0xf   :  { %3820 = vsyncadd [#allocation3], 4294942720 }
  0x10   :  { %3821 = dma.done.wait [#allocation6], 128  }
  0x11   :  { %3822 = vsyncadd [#allocation6], 4294967168 }
  0x12   :  { %3823 = dma.done.wait [#allocation9], 2048  }
  0x13   :  { %3824 = vsyncadd [#allocation9], 4294965248  ;;  %v2694_v0 = vld [vmem:[#allocation2 + $0xe0] sm:$0xf]  ;;  %v3486_v1 = vld [vmem:[#allocation2 + $0xec] sm:$0xf0] }
  0x14   :  { %v2822_v2 = vld [vmem:[#allocation2 + $0x1e0] sm:$0xf]  ;;  %v2695_v3 = vor.u32 %v3486_v1, %v2694_v0  ;;  %v3518_v4 = vld [vmem:[#allocation2 + $0x1ec] sm:$0xf0] }
  0x15   :  { %v2950_v5 = vld [vmem:[#allocation2 + $0x2e0] sm:$0xf]  ;;  %v3550_v6 = vld [vmem:[#allocation2 + $0x2ec] sm:$0xf0]  ;;  %v2823_v7 = vor.u32 %v3518_v4, %v2822_v2 }
  0x16   :  { %v2951_v8 = vor.u32 %v3550_v6, %v2950_v5  ;;  %v3078_v9 = vld [vmem:[#allocation2 + $0x3e0] sm:$0xf]  ;;  %v3582_v10 = vld [vmem:[#allocation2 + $0x3ec] sm:$0xf0]  ;;  %1270 = vmatpush.bf16.msra.mxu0 %v2695_v3 }
  0x17   :  { %v2678_v11 = vld [vmem:[#allocation2 + $0xc0] sm:$0xf]  ;;  %v3079_v12 = vor.u32 %v3582_v10, %v3078_v9  ;;  %v3482_v13 = vld [vmem:[#allocation2 + $0xcc] sm:$0xf0]  ;;  %1284 = vmatpush.bf16.msra.mxu1 %v2823_v7 }
  0x18   :  { %v2806_v14 = vld [vmem:[#allocation2 + $0x1c0] sm:$0xf]  ;;  %v3514_v15 = vld [vmem:[#allocation2 + $0x1cc] sm:$0xf0]  ;;  %1298 = vmatpush.bf16.msra.mxu2 %v2951_v8  ;;  %v2679_v16 = vor.u32 %v3482_v13, %v2678_v11 }
  0x19   :  { %v2807_v17 = vor.u32 %v3514_v15, %v2806_v14  ;;  %v2934_v18 = vld [vmem:[#allocation2 + $0x2c0] sm:$0xf]  ;;  %v3546_v19 = vld [vmem:[#allocation2 + $0x2cc] sm:$0xf0]  ;;  %1312 = vmatpush.bf16.msra.mxu3 %v3079_v12 }
  0x1a   :  { %v3062_v20 = vld [vmem:[#allocation2 + $0x3c0] sm:$0xf]  ;;  %v2935_v21 = vor.u32 %v3546_v19, %v2934_v18  ;;  %v3578_v22 = vld [vmem:[#allocation2 + $0x3cc] sm:$0xf0]  ;;  %1271 = vmatpush.bf16.msra.mxu0 %v2679_v16 }
  0x1b   :  { %v2662_v23 = vld [vmem:[#allocation2 + $0xa0] sm:$0xf]  ;;  %v3478_v24 = vld [vmem:[#allocation2 + $0xac] sm:$0xf0]  ;;  %v3063_v25 = vor.u32 %v3578_v22, %v3062_v20  ;;  %1285 = vmatpush.bf16.msra.mxu1 %v2807_v17 }
  0x1c   :  { %v2790_v26 = vld [vmem:[#allocation2 + $0x1a0] sm:$0xf]  ;;  %v3510_v27 = vld [vmem:[#allocation2 + $0x1ac] sm:$0xf0]  ;;  %v2663_v29 = vor.u32 %v3478_v24, %v2662_v23  ;;  %1299 = vmatpush.bf16.msra.mxu2 %v2935_v21 }
  0x1d   :  { %v2918_v28 = vld [vmem:[#allocation2 + $0x2a0] sm:$0xf]  ;;  %v3542_v30 = vld [vmem:[#allocation2 + $0x2ac] sm:$0xf0]  ;;  %v2791_v33 = vor.u32 %v3510_v27, %v2790_v26  ;;  %1313 = vmatpush.bf16.msra.mxu3 %v3063_v25 }
  0x1e   :  { %v3046_v31 = vld [vmem:[#allocation2 + $0x3a0] sm:$0xf]  ;;  %v3574_v32 = vld [vmem:[#allocation2 + $0x3ac] sm:$0xf0]  ;;  %v2919_v34 = vor.u32 %v3542_v30, %v2918_v28  ;;  %1272 = vmatpush.bf16.msra.mxu0 %v2663_v29 }
  0x1f   :  { %v2646_v35 = vld [vmem:[#allocation2 + $0x80] sm:$0xf]  ;;  %v3474_v36 = vld [vmem:[#allocation2 + $0x8c] sm:$0xf0]  ;;  %v3047_v38 = vor.u32 %v3574_v32, %v3046_v31  ;;  %1286 = vmatpush.bf16.msra.mxu1 %v2791_v33  ;;  %v3484_v33 = vld [vmem:[#allocation2 + $0xe4] sm:$0xf] }
  0x20   :  { %v2774_v37 = vld [vmem:[#allocation2 + $0x180] sm:$0xf]  ;;  %v3506_v39 = vld [vmem:[#allocation2 + $0x18c] sm:$0xf0]  ;;  %v2647_v44 = vor.u32 %v3474_v36, %v2646_v35  ;;  %1300 = vmatpush.bf16.msra.mxu2 %v2919_v34  ;;  %v2696_v34 = vld [vmem:[#allocation2 + $0xf0] sm:$0xf0] }
  0x21   :  { %v2902_v40 = vld [vmem:[#allocation2 + $0x280] sm:$0xf]  ;;  %v3538_v41 = vld [vmem:[#allocation2 + $0x28c] sm:$0xf0]  ;;  %v2775_v45 = vor.u32 %v3506_v39, %v2774_v37  ;;  %1314 = vmatpush.bf16.msra.mxu3 %v3047_v38  ;;  %v3516_v37 = vld [vmem:[#allocation2 + $0x1e4] sm:$0xf] }
  0x22   :  { %v3030_v42 = vld [vmem:[#allocation2 + $0x380] sm:$0xf]  ;;  %v3570_v43 = vld [vmem:[#allocation2 + $0x38c] sm:$0xf0]  ;;  %v2903_v46 = vor.u32 %v3538_v41, %v2902_v40  ;;  %1273 = vmatpush.bf16.msra.mxu0 %v2647_v44  ;;  %v2824_v38 = vld [vmem:[#allocation2 + $0x1f0] sm:$0xf0] }
  0x23   :  { %v2630_v47 = vld [vmem:[#allocation2 + $0x60] sm:$0xf]  ;;  %v3470_v48 = vld [vmem:[#allocation2 + $0x6c] sm:$0xf0]  ;;  %v3031_v50 = vor.u32 %v3570_v43, %v3030_v42  ;;  %1287 = vmatpush.bf16.msra.mxu1 %v2775_v45  ;;  %v2699_v43 = vor.u32 %v3484_v33, %v2696_v34  ;;  %v2632_v33 = vld [vmem:[#allocation2 + $0x70] sm:$0xf0] }
  0x24   :  { %v2758_v49 = vld [vmem:[#allocation2 + $0x160] sm:$0xf]  ;;  %v3502_v51 = vld [vmem:[#allocation2 + $0x16c] sm:$0xf0]  ;;  %v2631_v56 = vor.u32 %v3470_v48, %v2630_v47  ;;  %1301 = vmatpush.bf16.msra.mxu2 %v2903_v46  ;;  %v2827_v47 = vor.u32 %v3516_v37, %v2824_v38  ;;  %v3480_v48 = vld [vmem:[#allocation2 + $0xc4] sm:$0xf] }
  0x25   :  { %v2886_v52 = vld [vmem:[#allocation2 + $0x260] sm:$0xf]  ;;  %v3534_v53 = vld [vmem:[#allocation2 + $0x26c] sm:$0xf0]  ;;  %v2759_v57 = vor.u32 %v3502_v51, %v2758_v49  ;;  %1315 = vmatpush.bf16.msra.mxu3 %v3031_v50  ;;  %v2680_v49 = vld [vmem:[#allocation2 + $0xd0] sm:$0xf0] }
  0x26   :  { %v3014_v54 = vld [vmem:[#allocation2 + $0x360] sm:$0xf]  ;;  %v3566_v55 = vld [vmem:[#allocation2 + $0x36c] sm:$0xf0]  ;;  %v2887_v58 = vor.u32 %v3534_v53, %v2886_v52  ;;  %1274 = vmatpush.bf16.msra.mxu0 %v2631_v56  ;;  %v3512_v50 = vld [vmem:[#allocation2 + $0x1c4] sm:$0xf] }
  0x27   :  { %v2614_v59 = vld [vmem:[#allocation2 + $0x40] sm:$0xf]  ;;  %v3466_v60 = vld [vmem:[#allocation2 + $0x4c] sm:$0xf0]  ;;  %v3015_v62 = vor.u32 %v3566_v55, %v3014_v54  ;;  %1288 = vmatpush.bf16.msra.mxu1 %v2759_v57  ;;  %v2808_v51 = vld [vmem:[#allocation2 + $0x1d0] sm:$0xf0] }
  0x28   :  { %v2742_v61 = vld [vmem:[#allocation2 + $0x140] sm:$0xf]  ;;  %v3498_v63 = vld [vmem:[#allocation2 + $0x14c] sm:$0xf0]  ;;  %v2615_v4 = vor.u32 %v3466_v60, %v2614_v59  ;;  %1302 = vmatpush.bf16.msra.mxu2 %v2887_v58  ;;  %v2683_v59 = vor.u32 %v3480_v48, %v2680_v49  ;;  %v3500_v34 = vld [vmem:[#allocation2 + $0x164] sm:$0xf] }
  0x29   :  { %v2870_v0 = vld [vmem:[#allocation2 + $0x240] sm:$0xf]  ;;  %v3530_v1 = vld [vmem:[#allocation2 + $0x24c] sm:$0xf0]  ;;  %v2743_v5 = vor.u32 %v3498_v63, %v2742_v61  ;;  %1316 = vmatpush.bf16.msra.mxu3 %v3015_v62  ;;  %v3476_v62 = vld [vmem:[#allocation2 + $0xa4] sm:$0xf]  ;;  %v2811_v63 = vor.u32 %v3512_v50, %v2808_v51 }
  0x2a   :  { %v2998_v2 = vld [vmem:[#allocation2 + $0x340] sm:$0xf]  ;;  %v3562_v3 = vld [vmem:[#allocation2 + $0x34c] sm:$0xf0]  ;;  %v2871_v6 = vor.u32 %v3530_v1, %v2870_v0  ;;  %1275 = vmatpush.bf16.msra.mxu0 %v2615_v4  ;;  %v2664_v0 = vld [vmem:[#allocation2 + $0xb0] sm:$0xf0] }
  0x2b   :  { %v2598_v7 = vld [vmem:[#allocation2 + $0x20] sm:$0xf]  ;;  %v3462_v8 = vld [vmem:[#allocation2 + $0x2c] sm:$0xf0]  ;;  %v2999_v10 = vor.u32 %v3562_v3, %v2998_v2  ;;  %1289 = vmatpush.bf16.msra.mxu1 %v2743_v5  ;;  %v91_v1 = vld [vmem:[%s4573_s2 + $0x8] sm:$0xff] }
  0x2c   :  { %v2726_v9 = vld [vmem:[#allocation2 + $0x120] sm:$0xf]  ;;  %v3494_v11 = vld [vmem:[#allocation2 + $0x12c] sm:$0xf0]  ;;  %v2599_v16 = vor.u32 %v3462_v8, %v2598_v7  ;;  %1303 = vmatpush.bf16.msra.mxu2 %v2871_v6  ;;  %v97_v2 = vld [vmem:[%s4573_s2 + $0x38] sm:$0xff] }
  0x2d   :  { %v2854_v12 = vld [vmem:[#allocation2 + $0x220] sm:$0xf]  ;;  %v3526_v13 = vld [vmem:[#allocation2 + $0x22c] sm:$0xf0]  ;;  %v2727_v19 = vor.u32 %v3494_v11, %v2726_v9  ;;  %1317 = vmatpush.bf16.msra.mxu3 %v2999_v10  ;;  %v3508_v3 = vld [vmem:[#allocation2 + $0x1a4] sm:$0xf]  ;;  %v3915_v6 = vpack.c.bf16 %v97_v2, %v91_v1 }
  0x2e   :  { %v2982_v14 = vld [vmem:[#allocation2 + $0x320] sm:$0xf]  ;;  %v3558_v15 = vld [vmem:[#allocation2 + $0x32c] sm:$0xf0]  ;;  %v2855_v20 = vor.u32 %v3526_v13, %v2854_v12  ;;  %1276 = vmatpush.bf16.msra.mxu0 %v2599_v16  ;;  %v2792_v4 = vld [vmem:[#allocation2 + $0x1b0] sm:$0xf0]  ;;  %v2667_v12 = vor.u32 %v3476_v62, %v2664_v0 }
  0x2f   :  { %v2582_v17 = vld [vmem:[#allocation2] sm:$0xf]  ;;  %v3458_v18 = vld [vmem:[#allocation2 + $0xc] sm:$0xf0]  ;;  %v2983_v24 = vor.u32 %v3558_v15, %v2982_v14  ;;  %1290 = vmatpush.bf16.msra.mxu1 %v2727_v19  ;;  %v3472_v13 = vld [vmem:[#allocation2 + $0x84] sm:$0xf]  ;;  %v2795_v16 = vor.u32 %v3508_v3, %v2792_v4 }
  0x30   :  { %v2710_v21 = vld [vmem:[#allocation2 + $0x100] sm:$0xf]  ;;  %v3490_v22 = vld [vmem:[#allocation2 + $0x10c] sm:$0xf0]  ;;  %v2583_v31 = vor.u32 %v3458_v18, %v2582_v17  ;;  %1304 = vmatpush.bf16.msra.mxu2 %v2855_v20  ;;  %v2648_v14 = vld [vmem:[#allocation2 + $0x90] sm:$0xf0] }
  0x31   :  { %v2838_v23 = vld [vmem:[#allocation2 + $0x200] sm:$0xf]  ;;  %v3522_v25 = vld [vmem:[#allocation2 + $0x20c] sm:$0xf0]  ;;  %v2711_v35 = vor.u32 %v3490_v22, %v2710_v21  ;;  %1318 = vmatpush.bf16.msra.mxu3 %v2983_v24  ;;  %v93_v18 = vld [vmem:[%s4573_s2 + $0x18] sm:$0xff] }
  0x32   :  { %v2966_v26 = vld [vmem:[#allocation2 + $0x300] sm:$0xf]  ;;  %v3554_v27 = vld [vmem:[#allocation2 + $0x30c] sm:$0xf0]  ;;  %v2839_v36 = vor.u32 %v3522_v25, %v2838_v23  ;;  %1277 = vmatpush.bf16.msra.mxu0 %v2583_v31  ;;  %v99_v19 = vld [vmem:[%s4573_s2 + $0x48] sm:$0xff] }
  0x33   :  { %v3206_v28 = vld [vmem:[#allocation2 + $0x4e0] sm:$0xf]  ;;  %v3614_v29 = vld [vmem:[#allocation2 + $0x4ec] sm:$0xf0]  ;;  %v2967_v39 = vor.u32 %v3554_v27, %v2966_v26  ;;  %1291 = vmatpush.bf16.msra.mxu1 %v2711_v35  ;;  %v3504_v20 = vld [vmem:[#allocation2 + $0x184] sm:$0xf]  ;;  %v3932_v23 = vpack.c.bf16 %v99_v19, %v93_v18  ;;  %v2651_v26 = vor.u32 %v3472_v13, %v2648_v14 }
  0x34   :  { %v3334_v30 = vld [vmem:[#allocation2 + $0x5e0] sm:$0xf]  ;;  %v3646_v32 = vld [vmem:[#allocation2 + $0x5ec] sm:$0xf0]  ;;  %v3207_v40 = vor.u32 %v3614_v29, %v3206_v28  ;;  %1305 = vmatpush.bf16.msra.mxu2 %v2839_v36  ;;  %v2776_v21 = vld [vmem:[#allocation2 + $0x190] sm:$0xf0] }
  0x35   :  { %v3190_v41 = vld [vmem:[#allocation2 + $0x4c0] sm:$0xf]  ;;  %v3335_v42 = vor.u32 %v3646_v32, %v3334_v30  ;;  %v3610_v44 = vld [vmem:[#allocation2 + $0x4cc] sm:$0xf0]  ;;  %1319 = vmatpush.bf16.msra.mxu3 %v2967_v39  ;;  %v2779_v30 = vor.u32 %v3504_v20, %v2776_v21  ;;  %v3468_v32 = vld [vmem:[#allocation2 + $0x64] sm:$0xf] }
  0x36   :  { %v3318_v45 = vld [vmem:[#allocation2 + $0x5c0] sm:$0xf]  ;;  %v3642_v46 = vld [vmem:[#allocation2 + $0x5cc] sm:$0xf0]  ;;  %1326 = vmatpush.bf16.msrb.mxu0 %v3207_v40  ;;  %v3191_v54 = vor.u32 %v3610_v44, %v3190_v41  ;;  %1292 = vmatmul.bf16.vlgmr.msra.gmra.mxu1 %v3915_v6  ;;  %v2760_v35 = vld [vmem:[#allocation2 + $0x170] sm:$0xf0]  ;;  %v2635_v38 = vor.u32 %v3468_v32, %v2632_v33 }
  0x37   :  { %v90_v52 = vld [vmem:[%s4573_s2] sm:$0xff]  ;;  %v96_v53 = vld [vmem:[%s4573_s2 + $0x30] sm:$0xff]  ;;  %1340 = vmatpush.bf16.msrb.mxu1 %v3335_v42  ;;  %v3319_v58 = vor.u32 %v3642_v46, %v3318_v45  ;;  %v2763_v42 = vor.u32 %v3500_v34, %v2760_v35 }
  0x38   :  { %v3174_v55 = vld [vmem:[#allocation2 + $0x4a0] sm:$0xf]  ;;  %v3606_v56 = vld [vmem:[#allocation2 + $0x4ac] sm:$0xf0]  ;;  %v3906_v57 = vpack.c.bf16 %v96_v53, %v90_v52  ;;  %1354 = vmatpush.bf16.msrb.mxu2 %v2699_v43  ;;  %1320 = vmatmul.bf16.vlgmr.msra.gmra.mxu3 %v3932_v23  ;;  %v3464_v44 = vld [vmem:[#allocation2 + $0x44] sm:$0xf] }
  0x39   :  { %v3302_v60 = vld [vmem:[#allocation2 + $0x5a0] sm:$0xf]  ;;  %v3638_v61 = vld [vmem:[#allocation2 + $0x5ac] sm:$0xf0]  ;;  %1368 = vmatpush.bf16.msrb.mxu3 %v2827_v47  ;;  %v3175_v7 = vor.u32 %v3606_v56, %v3174_v55  ;;  %v2616_v45 = vld [vmem:[#allocation2 + $0x50] sm:$0xf0] }
  0x3a   :  { %1278 = vmatmul.bf16.vlgmr.msra.gmra.mxu0 %v3906_v57  ;;  %v3158_v5 = vld [vmem:[#allocation2 + $0x480] sm:$0xf]  ;;  %v3602_v8 = vld [vmem:[#allocation2 + $0x48c] sm:$0xf0]  ;;  %v3303_v11 = vor.u32 %v3638_v61, %v3302_v60  ;;  %v3496_v46 = vld [vmem:[#allocation2 + $0x144] sm:$0xf]  ;;  %v2619_v50 = vor.u32 %v3464_v44, %v2616_v45 }
  0x3b   :  { %1327 = vmatpush.bf16.msrb.mxu0 %v3191_v54  ;;  %v3286_v9 = vld [vmem:[#allocation2 + $0x580] sm:$0xf]  ;;  %v3634_v10 = vld [vmem:[#allocation2 + $0x58c] sm:$0xf0]  ;;  %1341 = vmatpush.bf16.msrb.mxu1 %v3319_v58  ;;  %v3159_v24 = vor.u32 %v3602_v8, %v3158_v5  ;;  %v2744_v47 = vld [vmem:[#allocation2 + $0x150] sm:$0xf0] }
  0x3c   :  { %1355 = vmatpush.bf16.msrb.mxu2 %v2683_v59  ;;  %v92_v15 = vld [vmem:[%s4573_s2 + $0x10] sm:$0xff]  ;;  %v98_v17 = vld [vmem:[%s4573_s2 + $0x40] sm:$0xff]  ;;  %v3287_v25 = vor.u32 %v3634_v10, %v3286_v9  ;;  %v2747_v54 = vor.u32 %v3496_v46, %v2744_v47 }
  0x3d   :  { %1369 = vmatpush.bf16.msrb.mxu3 %v2811_v63  ;;  %v3930_v22 = vpack.c.bf16 %v98_v17, %v92_v15  ;;  %v3142_v27 = vld [vmem:[#allocation2 + $0x460] sm:$0xf]  ;;  %v3598_v28 = vld [vmem:[#allocation2 + $0x46c] sm:$0xf0]  ;;  %v3460_v56 = vld [vmem:[#allocation2 + $0x24] sm:$0xf] }
  0x3e   :  { %v3270_v29 = vld [vmem:[#allocation2 + $0x560] sm:$0xf]  ;;  %v3630_v31 = vld [vmem:[#allocation2 + $0x56c] sm:$0xf0]  ;;  %v3143_v36 = vor.u32 %v3598_v28, %v3142_v27  ;;  %v2600_v58 = vld [vmem:[#allocation2 + $0x30] sm:$0xf0] }
  0x3f   :  { %1328 = vmatpush.bf16.msrb.mxu0 %v3175_v7  ;;  %1342 = vmatpush.bf16.msrb.mxu1 %v3303_v11  ;;  %v3271_v37 = vor.u32 %v3630_v31, %v3270_v29  ;;  %v3126_v39 = vld [vmem:[#allocation2 + $0x440] sm:$0xf]  ;;  %v3594_v40 = vld [vmem:[#allocation2 + $0x44c] sm:$0xf0]  ;;  %v3492_v59 = vld [vmem:[#allocation2 + $0x124] sm:$0xf]  ;;  %v2603_v2 = vor.u32 %v3460_v56, %v2600_v58 }
  0x40   :  { %1356 = vmatpush.bf16.msrb.mxu2 %v2667_v12  ;;  %v3254_v41 = vld [vmem:[#allocation2 + $0x540] sm:$0xf]  ;;  %v3626_v43 = vld [vmem:[#allocation2 + $0x54c] sm:$0xf0]  ;;  %v3127_v48 = vor.u32 %v3594_v40, %v3126_v39  ;;  %v2728_v60 = vld [vmem:[#allocation2 + $0x130] sm:$0xf0] }
  0x41   :  { %1370 = vmatpush.bf16.msrb.mxu3 %v2795_v16  ;;  %1306 = vmatmul.bf16.vlgmr.msra.gmra.mxu2 %v3930_v22  ;;  %v3255_v49 = vor.u32 %v3626_v43, %v3254_v41  ;;  %v3110_v51 = vld [vmem:[#allocation2 + $0x420] sm:$0xf]  ;;  %v3590_v52 = vld [vmem:[#allocation2 + $0x42c] sm:$0xf0]  ;;  %v3456_v4 = vld [vmem:[#allocation2 + $0x4] sm:$0xf]  ;;  %v2731_v7 = vor.u32 %v3492_v59, %v2728_v60 }
  0x42   :  { %v3238_v53 = vld [vmem:[#allocation2 + $0x520] sm:$0xf]  ;;  %v3622_v55 = vld [vmem:[#allocation2 + $0x52c] sm:$0xf0]  ;;  %v3111_v61 = vor.u32 %v3590_v52, %v3110_v51  ;;  %v2584_v5 = vld [vmem:[#allocation2 + $0x10] sm:$0xf0] }
  0x43   :  { %1329 = vmatpush.bf16.msrb.mxu0 %v3159_v24  ;;  %1343 = vmatpush.bf16.msrb.mxu1 %v3287_v25  ;;  %v3094_v62 = vld [vmem:[#allocation2 + $0x400] sm:$0xf]  ;;  %v3586_v63 = vld [vmem:[#allocation2 + $0x40c] sm:$0xf0]  ;;  %v3239_v1 = vor.u32 %v3622_v55, %v3238_v53  ;;  %v3488_v8 = vld [vmem:[#allocation2 + $0x104] sm:$0xf]  ;;  %v2587_v19 = vor.u32 %v3456_v4, %v2584_v5 }
  0x44   :  { %1357 = vmatpush.bf16.msrb.mxu2 %v2651_v26  ;;  %v3222_v0 = vld [vmem:[#allocation2 + $0x500] sm:$0xf]  ;;  %v3618_v3 = vld [vmem:[#allocation2 + $0x50c] sm:$0xf0]  ;;  %v2712_v9 = vld [vmem:[#allocation2 + $0x110] sm:$0xf0]  ;;  %v3095_v14 = vor.u32 %v3586_v63, %v3094_v62 }
  0x45   :  { %1371 = vmatpush.bf16.msrb.mxu3 %v2779_v30  ;;  %v3548_v10 = vld [vmem:[#allocation2 + $0x2e4] sm:$0xf]  ;;  %v2952_v11 = vld [vmem:[#allocation2 + $0x2f0] sm:$0xf0]  ;;  %v3223_v18 = vor.u32 %v3618_v3, %v3222_v0  ;;  %v2715_v25 = vor.u32 %v3488_v8, %v2712_v9  ;;  %v95_v27 = vld [vmem:[%s4573_s2 + $0x28] sm:$0xff] }
  0x46   :  { %v3580_v12 = vld [vmem:[#allocation2 + $0x3e4] sm:$0xf]  ;;  %v3080_v13 = vld [vmem:[#allocation2 + $0x3f0] sm:$0xf0]  ;;  %v2955_v26 = vor.u32 %v3548_v10, %v2952_v11  ;;  %v101_v28 = vld [vmem:[%s4573_s2 + $0x58] sm:$0xff] }
  0x47   :  { %1330 = vmatpush.bf16.msrb.mxu0 %v3143_v36  ;;  %1344 = vmatpush.bf16.msrb.mxu1 %v3271_v37  ;;  %v3612_v15 = vld [vmem:[#allocation2 + $0x4e4] sm:$0xf]  ;;  %v3208_v16 = vld [vmem:[#allocation2 + $0x4f0] sm:$0xf0]  ;;  %v3083_v29 = vor.u32 %v3580_v12, %v3080_v13  ;;  %v3950_v39 = vpack.c.bf16 %v101_v28, %v95_v27 }
  0x48   :  { %1358 = vmatpush.bf16.msrb.mxu2 %v2635_v38  ;;  %v3644_v17 = vld [vmem:[#allocation2 + $0x5e4] sm:$0xf]  ;;  %v3336_v20 = vld [vmem:[#allocation2 + $0x5f0] sm:$0xf0]  ;;  %v3211_v30 = vor.u32 %v3612_v15, %v3208_v16 }
  0x49   :  { %1372 = vmatpush.bf16.msrb.mxu3 %v2763_v42  ;;  %v94_v21 = vld [vmem:[%s4573_s2 + $0x20] sm:$0xff]  ;;  %v100_v24 = vld [vmem:[%s4573_s2 + $0x50] sm:$0xff]  ;;  %v3339_v34 = vor.u32 %v3644_v17, %v3336_v20 }
  0x4a   :  { %v3544_v31 = vld [vmem:[#allocation2 + $0x2c4] sm:$0xf]  ;;  %v2936_v32 = vld [vmem:[#allocation2 + $0x2d0] sm:$0xf0]  ;;  %v3948_v35 = vpack.c.bf16 %v100_v24, %v94_v21 }
  0x4b   :  { %1331 = vmatpush.bf16.msrb.mxu0 %v3127_v48  ;;  %1345 = vmatpush.bf16.msrb.mxu1 %v3255_v49  ;;  %v3576_v33 = vld [vmem:[#allocation2 + $0x3c4] sm:$0xf]  ;;  %v3064_v36 = vld [vmem:[#allocation2 + $0x3d0] sm:$0xf0]  ;;  %v2939_v42 = vor.u32 %v3544_v31, %v2936_v32 }
  0x4c   :  { %1359 = vmatpush.bf16.msrb.mxu2 %v2619_v50  ;;  %v3608_v37 = vld [vmem:[#allocation2 + $0x4c4] sm:$0xf]  ;;  %v3192_v38 = vld [vmem:[#allocation2 + $0x4d0] sm:$0xf0]  ;;  %v3067_v43 = vor.u32 %v3576_v33, %v3064_v36 }
  0x4d   :  { %1373 = vmatpush.bf16.msrb.mxu3 %v2747_v54  ;;  %v3640_v40 = vld [vmem:[#allocation2 + $0x5c4] sm:$0xf]  ;;  %v3320_v41 = vld [vmem:[#allocation2 + $0x5d0] sm:$0xf0]  ;;  %v3195_v44 = vor.u32 %v3608_v37, %v3192_v38 }
  0x4e   :  { %v3540_v45 = vld [vmem:[#allocation2 + $0x2a4] sm:$0xf]  ;;  %v2920_v46 = vld [vmem:[#allocation2 + $0x2b0] sm:$0xf0]  ;;  %v3323_v48 = vor.u32 %v3640_v40, %v3320_v41 }
  0x4f   :  { %1332 = vmatpush.bf16.msrb.mxu0 %v3111_v61  ;;  %1346 = vmatpush.bf16.msrb.mxu1 %v3239_v1  ;;  %v3572_v47 = vld [vmem:[#allocation2 + $0x3a4] sm:$0xf]  ;;  %v3048_v49 = vld [vmem:[#allocation2 + $0x3b0] sm:$0xf0]  ;;  %v2923_v54 = vor.u32 %v3540_v45, %v2920_v46 }
  0x50   :  { %1360 = vmatpush.bf16.msrb.mxu2 %v2603_v2  ;;  %v3604_v50 = vld [vmem:[#allocation2 + $0x4a4] sm:$0xf]  ;;  %v3176_v51 = vld [vmem:[#allocation2 + $0x4b0] sm:$0xf0]  ;;  %v3051_v55 = vor.u32 %v3572_v47, %v3048_v49 }
  0x51   :  { %1374 = vmatpush.bf16.msrb.mxu3 %v2731_v7  ;;  %v3636_v52 = vld [vmem:[#allocation2 + $0x5a4] sm:$0xf]  ;;  %v3304_v53 = vld [vmem:[#allocation2 + $0x5b0] sm:$0xf0]  ;;  %v3179_v56 = vor.u32 %v3604_v50, %v3176_v51 }
  0x52   :  { %v3536_v58 = vld [vmem:[#allocation2 + $0x284] sm:$0xf]  ;;  %v2904_v59 = vld [vmem:[#allocation2 + $0x290] sm:$0xf0]  ;;  %v3307_v61 = vor.u32 %v3636_v52, %v3304_v53 }
  0x53   :  { %1333 = vmatpush.bf16.msrb.mxu0 %v3095_v14  ;;  %1347 = vmatpush.bf16.msrb.mxu1 %v3223_v18  ;;  %v3568_v60 = vld [vmem:[#allocation2 + $0x384] sm:$0xf]  ;;  %v3032_v62 = vld [vmem:[#allocation2 + $0x390] sm:$0xf0]  ;;  %v2907_v3 = vor.u32 %v3536_v58, %v2904_v59  ;;  %v3487_v58 = vld [vmem:[#allocation2 + $0xf4] sm:$0xf0] }
  0x54   :  { %1361 = vmatpush.bf16.msrb.mxu2 %v2587_v19  ;;  %v3600_v63 = vld [vmem:[#allocation2 + $0x484] sm:$0xf]  ;;  %v3160_v0 = vld [vmem:[#allocation2 + $0x490] sm:$0xf0]  ;;  %v3035_v4 = vor.u32 %v3568_v60, %v3032_v62  ;;  %v2830_v59 = vld [vmem:[#allocation2 + $0x1e8] sm:$0xf] }
  0x55   :  { %1375 = vmatpush.bf16.msrb.mxu3 %v2715_v25  ;;  %v3632_v1 = vld [vmem:[#allocation2 + $0x584] sm:$0xf]  ;;  %v3288_v2 = vld [vmem:[#allocation2 + $0x590] sm:$0xf0]  ;;  %v3163_v5 = vor.u32 %v3600_v63, %v3160_v0  ;;  %v2958_v62 = vld [vmem:[#allocation2 + $0x2e8] sm:$0xf] }
  0x56   :  { %1334 = vmatmul.bf16.vlgmr.msrb.gmra.mxu0 %v3948_v35  ;;  %1348 = vmatmul.bf16.vlgmr.msrb.gmra.mxu1 %v3950_v39  ;;  %v3532_v7 = vld [vmem:[#allocation2 + $0x264] sm:$0xf]  ;;  %v2888_v8 = vld [vmem:[#allocation2 + $0x270] sm:$0xf0]  ;;  %v3291_v10 = vor.u32 %v3632_v1, %v3288_v2  ;;  %v3551_v63 = vld [vmem:[#allocation2 + $0x2f4] sm:$0xf0] }
  0x57   :  { %1382 = vmatpush.bf16.msra.mxu0 %v2955_v26  ;;  %1396 = vmatpush.bf16.msra.mxu1 %v3083_v29  ;;  %v3564_v9 = vld [vmem:[#allocation2 + $0x364] sm:$0xf]  ;;  %v3016_v11 = vld [vmem:[#allocation2 + $0x370] sm:$0xf0]  ;;  %v2891_v16 = vor.u32 %v3532_v7, %v2888_v8  ;;  %v3086_v2 = vld [vmem:[#allocation2 + $0x3e8] sm:$0xf]  ;;  %v2959_v8 = vor.u32 %v3551_v63, %v2958_v62 }
  0x58   :  { %1410 = vmatpush.bf16.msra.mxu2 %v3211_v30  ;;  %1376 = vmatmul.bf16.vlgmr.msrb.gmra.mxu3 %v3915_v6  ;;  %v3596_v12 = vld [vmem:[#allocation2 + $0x464] sm:$0xf]  ;;  %v3144_v13 = vld [vmem:[#allocation2 + $0x470] sm:$0xf0]  ;;  %v3019_v17 = vor.u32 %v3564_v9, %v3016_v11  ;;  %v2686_v9 = vld [vmem:[#allocation2 + $0xc8] sm:$0xf] }
  0x59   :  { %1424 = vmatpush.bf16.msra.mxu3 %v3339_v34  ;;  %1362 = vmatmul.bf16.vlgmr.msrb.gmra.mxu2 %v3906_v57  ;;  %v3628_v14 = vld [vmem:[#allocation2 + $0x564] sm:$0xf]  ;;  %v3272_v15 = vld [vmem:[#allocation2 + $0x570] sm:$0xf0]  ;;  %v3147_v18 = vor.u32 %v3596_v12, %v3144_v13  ;;  %v2814_v11 = vld [vmem:[#allocation2 + $0x1c8] sm:$0xf] }
  0x5a   :  { %v3528_v19 = vld [vmem:[#allocation2 + $0x244] sm:$0xf]  ;;  %v2872_v20 = vld [vmem:[#allocation2 + $0x250] sm:$0xf0]  ;;  %v3275_v24 = vor.u32 %v3628_v14, %v3272_v15  ;;  %v3515_v13 = vld [vmem:[#allocation2 + $0x1d4] sm:$0xf0] }
  0x5b   :  { %1383 = vmatpush.bf16.msra.mxu0 %v2939_v42  ;;  %1397 = vmatpush.bf16.msra.mxu1 %v3067_v43  ;;  %v3560_v21 = vld [vmem:[#allocation2 + $0x344] sm:$0xf]  ;;  %v3000_v25 = vld [vmem:[#allocation2 + $0x350] sm:$0xf0]  ;;  %v2875_v30 = vor.u32 %v3528_v19, %v2872_v20  ;;  %v2942_v14 = vld [vmem:[#allocation2 + $0x2c8] sm:$0xf]  ;;  %v2815_v19 = vor.u32 %v3515_v13, %v2814_v11 }
  0x5c   :  { %1411 = vmatpush.bf16.msra.mxu2 %v3195_v44  ;;  %v3592_v26 = vld [vmem:[#allocation2 + $0x444] sm:$0xf]  ;;  %v3128_v27 = vld [vmem:[#allocation2 + $0x450] sm:$0xf0]  ;;  %v3003_v31 = vor.u32 %v3560_v21, %v3000_v25  ;;  %v3547_v15 = vld [vmem:[#allocation2 + $0x2d4] sm:$0xf0] }
  0x5d   :  { %1425 = vmatpush.bf16.msra.mxu3 %v3323_v48  ;;  %v3624_v28 = vld [vmem:[#allocation2 + $0x544] sm:$0xf]  ;;  %v3256_v29 = vld [vmem:[#allocation2 + $0x550] sm:$0xf0]  ;;  %v3131_v32 = vor.u32 %v3592_v26, %v3128_v27  ;;  %v2943_v20 = vor.u32 %v3547_v15, %v2942_v14  ;;  %v2670_v21 = vld [vmem:[#allocation2 + $0xa8] sm:$0xf] }
  0x5e   :  { %v3524_v33 = vld [vmem:[#allocation2 + $0x224] sm:$0xf]  ;;  %v2856_v34 = vld [vmem:[#allocation2 + $0x230] sm:$0xf0]  ;;  %v3259_v37 = vor.u32 %v3624_v28, %v3256_v29  ;;  %v2798_v25 = vld [vmem:[#allocation2 + $0x1a8] sm:$0xf] }
  0x5f   :  { %1384 = vmatpush.bf16.msra.mxu0 %v2923_v54  ;;  %1398 = vmatpush.bf16.msra.mxu1 %v3051_v55  ;;  %v3556_v36 = vld [vmem:[#allocation2 + $0x324] sm:$0xf]  ;;  %v2984_v38 = vld [vmem:[#allocation2 + $0x330] sm:$0xf0]  ;;  %v2859_v44 = vor.u32 %v3524_v33, %v2856_v34  ;;  %v3511_v27 = vld [vmem:[#allocation2 + $0x1b4] sm:$0xf0] }
  0x60   :  { %1412 = vmatpush.bf16.msra.mxu2 %v3179_v56  ;;  %v3588_v40 = vld [vmem:[#allocation2 + $0x424] sm:$0xf]  ;;  %v3112_v41 = vld [vmem:[#allocation2 + $0x430] sm:$0xf0]  ;;  %v2987_v47 = vor.u32 %v3556_v36, %v2984_v38  ;;  %v2702_v56 = vld [vmem:[#allocation2 + $0xe8] sm:$0xf]  ;;  %v2799_v33 = vor.u32 %v3511_v27, %v2798_v25 }
  0x61   :  { %1426 = vmatpush.bf16.msra.mxu3 %v3307_v61  ;;  %v3620_v42 = vld [vmem:[#allocation2 + $0x524] sm:$0xf]  ;;  %v3240_v43 = vld [vmem:[#allocation2 + $0x530] sm:$0xf0]  ;;  %v3115_v48 = vor.u32 %v3588_v40, %v3112_v41  ;;  %v3519_v61 = vld [vmem:[#allocation2 + $0x1f4] sm:$0xf0] }
  0x62   :  { %v3520_v45 = vld [vmem:[#allocation2 + $0x204] sm:$0xf]  ;;  %v2840_v46 = vld [vmem:[#allocation2 + $0x210] sm:$0xf0]  ;;  %v3243_v52 = vor.u32 %v3620_v42, %v3240_v43  ;;  %v2831_v7 = vor.u32 %v3519_v61, %v2830_v59  ;;  %v2926_v28 = vld [vmem:[#allocation2 + $0x2a8] sm:$0xf] }
  0x63   :  { %1385 = vmatpush.bf16.msra.mxu0 %v2907_v3  ;;  %1399 = vmatpush.bf16.msra.mxu1 %v3035_v4  ;;  %v3552_v49 = vld [vmem:[#allocation2 + $0x304] sm:$0xf]  ;;  %v2968_v50 = vld [vmem:[#allocation2 + $0x310] sm:$0xf0]  ;;  %v2843_v60 = vor.u32 %v3520_v45, %v2840_v46  ;;  %v3583_v3 = vld [vmem:[#allocation2 + $0x3f4] sm:$0xf0] }
  0x64   :  { %1413 = vmatpush.bf16.msra.mxu2 %v3163_v5  ;;  %v3584_v51 = vld [vmem:[#allocation2 + $0x404] sm:$0xf]  ;;  %v3096_v53 = vld [vmem:[#allocation2 + $0x410] sm:$0xf0]  ;;  %v2971_v0 = vor.u32 %v3552_v49, %v2968_v50  ;;  %v2703_v5 = vor.u32 %v3487_v58, %v2702_v56  ;;  %v3087_v12 = vor.u32 %v3583_v3, %v3086_v2  ;;  %v3543_v29 = vld [vmem:[#allocation2 + $0x2b4] sm:$0xf0] }
  0x65   :  { %1427 = vmatpush.bf16.msra.mxu3 %v3291_v10  ;;  %v3616_v54 = vld [vmem:[#allocation2 + $0x504] sm:$0xf]  ;;  %v3224_v55 = vld [vmem:[#allocation2 + $0x510] sm:$0xf0]  ;;  %v3099_v1 = vor.u32 %v3584_v51, %v3096_v53  ;;  %v3483_v10 = vld [vmem:[#allocation2 + $0xd4] sm:$0xf0]  ;;  %v2927_v34 = vor.u32 %v3543_v29, %v2926_v28 }
  0x66   :  { %v3227_v4 = vor.u32 %v3616_v54, %v3224_v55  ;;  %v2654_v36 = vld [vmem:[#allocation2 + $0x88] sm:$0xf]  ;;  %v3507_v41 = vld [vmem:[#allocation2 + $0x194] sm:$0xf0] }
  0x67   :  { %1386 = vmatpush.bf16.msra.mxu0 %v2891_v16  ;;  %1400 = vmatpush.bf16.msra.mxu1 %v3019_v17  ;;  %v3070_v16 = vld [vmem:[#allocation2 + $0x3c8] sm:$0xf]  ;;  %v3579_v17 = vld [vmem:[#allocation2 + $0x3d4] sm:$0xf0] }
  0x68   :  { %1414 = vmatpush.bf16.msra.mxu2 %v3147_v18  ;;  %v2687_v18 = vor.u32 %v3483_v10, %v2686_v9  ;;  %v3071_v26 = vor.u32 %v3579_v17, %v3070_v16  ;;  %v2782_v38 = vld [vmem:[#allocation2 + $0x188] sm:$0xf]  ;;  %v3539_v43 = vld [vmem:[#allocation2 + $0x294] sm:$0xf0] }
  0x69   :  { %1428 = vmatpush.bf16.msra.mxu3 %v3275_v24  ;;  %v3479_v24 = vld [vmem:[#allocation2 + $0xb4] sm:$0xf0]  ;;  %v2910_v42 = vld [vmem:[#allocation2 + $0x288] sm:$0xf] }
  0x6a   :  { %v3571_v45 = vld [vmem:[#allocation2 + $0x394] sm:$0xf0]  ;;  %v2638_v49 = vld [vmem:[#allocation2 + $0x68] sm:$0xf] }
  0x6b   :  { %1387 = vmatpush.bf16.msra.mxu0 %v2875_v30  ;;  %1401 = vmatpush.bf16.msra.mxu1 %v3003_v31  ;;  %v3054_v30 = vld [vmem:[#allocation2 + $0x3a8] sm:$0xf]  ;;  %v3575_v31 = vld [vmem:[#allocation2 + $0x3b4] sm:$0xf0] }
  0x6c   :  { %1415 = vmatpush.bf16.msra.mxu2 %v3131_v32  ;;  %v2671_v32 = vor.u32 %v3479_v24, %v2670_v21  ;;  %v3055_v40 = vor.u32 %v3575_v31, %v3054_v30  ;;  %v3471_v50 = vld [vmem:[#allocation2 + $0x74] sm:$0xf0]  ;;  %v2766_v51 = vld [vmem:[#allocation2 + $0x168] sm:$0xf] }
  0x6d   :  { %1429 = vmatpush.bf16.msra.mxu3 %v3259_v37  ;;  %v3475_v37 = vld [vmem:[#allocation2 + $0x94] sm:$0xf0]  ;;  %v2894_v54 = vld [vmem:[#allocation2 + $0x268] sm:$0xf]  ;;  %v2639_v59 = vor.u32 %v3471_v50, %v2638_v49 }
  0x6e   :  { %v2655_v46 = vor.u32 %v3475_v37, %v2654_v36  ;;  %v3503_v53 = vld [vmem:[#allocation2 + $0x174] sm:$0xf0]  ;;  %v3022_v56 = vld [vmem:[#allocation2 + $0x368] sm:$0xf] }
  0x6f   :  { %1388 = vmatpush.bf16.msra.mxu0 %v2859_v44  ;;  %1402 = vmatpush.bf16.msra.mxu1 %v2987_v47  ;;  %v3038_v44 = vld [vmem:[#allocation2 + $0x388] sm:$0xf]  ;;  %v2783_v47 = vor.u32 %v3507_v41, %v2782_v38  ;;  %v3535_v55 = vld [vmem:[#allocation2 + $0x274] sm:$0xf0]  ;;  %v3485_v41 = vld [vmem:[#allocation2 + $0xec] sm:$0xf] }
  0x70   :  { %1416 = vmatpush.bf16.msra.mxu2 %v3115_v48  ;;  %v2911_v48 = vor.u32 %v3539_v43, %v2910_v42  ;;  %v3567_v58 = vld [vmem:[#allocation2 + $0x374] sm:$0xf0]  ;;  %v2895_v61 = vor.u32 %v3535_v55, %v2894_v54  ;;  %v2622_v62 = vld [vmem:[#allocation2 + $0x48] sm:$0xf]  ;;  %v2704_v42 = vld [vmem:[#allocation2 + $0xf8] sm:$0xf0] }
  0x71   :  { %1430 = vmatpush.bf16.msra.mxu3 %v3243_v52  ;;  %v3039_v52 = vor.u32 %v3571_v45, %v3038_v44  ;;  %v3467_v63 = vld [vmem:[#allocation2 + $0x54] sm:$0xf0]  ;;  %v2878_v3 = vld [vmem:[#allocation2 + $0x248] sm:$0xf]  ;;  %v3517_v45 = vld [vmem:[#allocation2 + $0x1ec] sm:$0xf]  ;;  %v2707_v50 = vor.u32 %v3485_v41, %v2704_v42 }
  0x72   :  { %v3499_v2 = vld [vmem:[#allocation2 + $0x154] sm:$0xf0]  ;;  %v2606_v11 = vld [vmem:[#allocation2 + $0x28] sm:$0xf] }
  0x73   :  { %1389 = vmatpush.bf16.msra.mxu0 %v2843_v60  ;;  %1403 = vmatpush.bf16.msra.mxu1 %v2971_v0  ;;  %v2767_v60 = vor.u32 %v3503_v53, %v2766_v51  ;;  %v2750_v0 = vld [vmem:[#allocation2 + $0x148] sm:$0xf]  ;;  %v3495_v15 = vld [vmem:[#allocation2 + $0x134] sm:$0xf0] }
  0x74   :  { %1417 = vmatpush.bf16.msra.mxu2 %v3099_v1  ;;  %v3023_v1 = vor.u32 %v3567_v58, %v3022_v56  ;;  %v2751_v9 = vor.u32 %v3499_v2, %v2750_v0  ;;  %v2734_v13 = vld [vmem:[#allocation2 + $0x128] sm:$0xf]  ;;  %v3527_v17 = vld [vmem:[#allocation2 + $0x234] sm:$0xf0]  ;;  %v3481_v56 = vld [vmem:[#allocation2 + $0xcc] sm:$0xf] }
  0x75   :  { %1431 = vmatpush.bf16.msra.mxu3 %v3227_v4  ;;  %v3531_v4 = vld [vmem:[#allocation2 + $0x254] sm:$0xf0]  ;;  %v2862_v16 = vld [vmem:[#allocation2 + $0x228] sm:$0xf]  ;;  %v2735_v25 = vor.u32 %v3495_v15, %v2734_v13  ;;  %v2688_v58 = vld [vmem:[#allocation2 + $0xd8] sm:$0xf0] }
  0x76   :  { %1390 = vmatmul.bf16.vlgmr.msra.gmra.mxu0 %v3930_v22  ;;  %1404 = vmatmul.bf16.vlgmr.msra.gmra.mxu1 %v3932_v23  ;;  %v2879_v10 = vor.u32 %v3531_v4, %v2878_v3  ;;  %v2590_v21 = vld [vmem:[#allocation2 + $0x8] sm:$0xf]  ;;  %v3459_v24 = vld [vmem:[#allocation2 + $0x14] sm:$0xf0] }
  0x77   :  { %1438 = vmatpush.bf16.msrb.mxu0 %v2703_v5  ;;  %1452 = vmatpush.bf16.msrb.mxu1 %v2831_v7  ;;  %v3006_v5 = vld [vmem:[#allocation2 + $0x348] sm:$0xf]  ;;  %v3563_v7 = vld [vmem:[#allocation2 + $0x354] sm:$0xf0]  ;;  %v2591_v38 = vor.u32 %v3459_v24, %v2590_v21  ;;  %v2784_v21 = vld [vmem:[#allocation2 + $0x198] sm:$0xf0] }
  0x78   :  { %1466 = vmatpush.bf16.msrb.mxu2 %v2959_v8  ;;  %1432 = vmatmul.bf16.vlgmr.msra.gmra.mxu3 %v3950_v39  ;;  %v2623_v8 = vor.u32 %v3467_v63, %v2622_v62  ;;  %v3007_v14 = vor.u32 %v3563_v7, %v3006_v5  ;;  %v2718_v27 = vld [vmem:[#allocation2 + $0x108] sm:$0xf]  ;;  %v3491_v28 = vld [vmem:[#allocation2 + $0x114] sm:$0xf0]  ;;  %v2691_v63 = vor.u32 %v3481_v56, %v2688_v58  ;;  %v3477_v5 = vld [vmem:[#allocation2 + $0xac] sm:$0xf] }
  0x79   :  { %1480 = vmatpush.bf16.msrb.mxu3 %v3087_v12  ;;  %1418 = vmatmul.bf16.vlgmr.msra.gmra.mxu2 %v3948_v35  ;;  %v3463_v12 = vld [vmem:[#allocation2 + $0x34] sm:$0xf0]  ;;  %v2846_v29 = vld [vmem:[#allocation2 + $0x208] sm:$0xf]  ;;  %v2719_v43 = vor.u32 %v3491_v28, %v2718_v27  ;;  %v2672_v7 = vld [vmem:[#allocation2 + $0xb8] sm:$0xf0] }
  0x7a   :  { %v3523_v31 = vld [vmem:[#allocation2 + $0x214] sm:$0xf0]  ;;  %v3342_v37 = vld [vmem:[#allocation2 + $0x5e8] sm:$0xf] }
  0x7b   :  { %1439 = vmatpush.bf16.msrb.mxu0 %v2687_v18  ;;  %1453 = vmatpush.bf16.msrb.mxu1 %v2815_v19  ;;  %v2990_v18 = vld [vmem:[#allocation2 + $0x328] sm:$0xf]  ;;  %v3559_v19 = vld [vmem:[#allocation2 + $0x334] sm:$0xf0]  ;;  %v2847_v44 = vor.u32 %v3523_v31, %v2846_v29 }
  0x7c   :  { %1467 = vmatpush.bf16.msrb.mxu2 %v2943_v20  ;;  %v2607_v20 = vor.u32 %v3463_v12, %v2606_v11  ;;  %v2991_v30 = vor.u32 %v3559_v19, %v2990_v18  ;;  %v3615_v36 = vld [vmem:[#allocation2 + $0x4f4] sm:$0xf0]  ;;  %v3198_v51 = vld [vmem:[#allocation2 + $0x4c8] sm:$0xf]  ;;  %v2675_v12 = vor.u32 %v3477_v5, %v2672_v7  ;;  %v3473_v18 = vld [vmem:[#allocation2 + $0x8c] sm:$0xf] }
  0x7d   :  { %1481 = vmatpush.bf16.msrb.mxu3 %v3071_v26  ;;  %v2863_v26 = vor.u32 %v3527_v17, %v2862_v16  ;;  %v3326_v53 = vld [vmem:[#allocation2 + $0x5c8] sm:$0xf]  ;;  %v3643_v55 = vld [vmem:[#allocation2 + $0x5d4] sm:$0xf0]  ;;  %v2656_v19 = vld [vmem:[#allocation2 + $0x98] sm:$0xf0] }
  0x7e   :  { %v3327_v62 = vor.u32 %v3643_v55, %v3326_v53  ;;  %v3182_v0 = vld [vmem:[#allocation2 + $0x4a8] sm:$0xf]  ;;  %v3639_v4 = vld [vmem:[#allocation2 + $0x5b4] sm:$0xf0]  ;;  %v3457_v7 = vld [vmem:[#allocation2 + $0xc] sm:$0xf] }
  0x7f   :  { %1440 = vmatpush.bf16.msrb.mxu0 %v2671_v32  ;;  %1454 = vmatpush.bf16.msrb.mxu1 %v2799_v33  ;;  %v2974_v32 = vld [vmem:[#allocation2 + $0x308] sm:$0xf]  ;;  %v3555_v33 = vld [vmem:[#allocation2 + $0x314] sm:$0xf0] }
  0x80   :  { %1468 = vmatpush.bf16.msrb.mxu2 %v2927_v34  ;;  %v3214_v34 = vld [vmem:[#allocation2 + $0x4e8] sm:$0xf]  ;;  %v3635_v17 = vld [vmem:[#allocation2 + $0x594] sm:$0xf0] }
  0x81   :  { %1482 = vmatpush.bf16.msrb.mxu3 %v3055_v40  ;;  %v3647_v40 = vld [vmem:[#allocation2 + $0x5f4] sm:$0xf0]  ;;  %v3310_v2 = vld [vmem:[#allocation2 + $0x5a8] sm:$0xf] }
  0x82   :  { %v3343_v49 = vor.u32 %v3647_v40, %v3342_v37  ;;  %v3311_v11 = vor.u32 %v3639_v4, %v3310_v2  ;;  %v3166_v13 = vld [vmem:[#allocation2 + $0x488] sm:$0xf]  ;;  %v3599_v28 = vld [vmem:[#allocation2 + $0x474] sm:$0xf0] }
  0x83   :  { %1441 = vmatpush.bf16.msrb.mxu0 %v2655_v46  ;;  %1455 = vmatpush.bf16.msrb.mxu1 %v2783_v47  ;;  %v2832_v46 = vld [vmem:[#allocation2 + $0x1f8] sm:$0xf0]  ;;  %v2975_v47 = vor.u32 %v3555_v33, %v2974_v32  ;;  %v3294_v15 = vld [vmem:[#allocation2 + $0x588] sm:$0xf]  ;;  %v3631_v31 = vld [vmem:[#allocation2 + $0x574] sm:$0xf0] }
  0x84   :  { %1469 = vmatpush.bf16.msrb.mxu2 %v2911_v48  ;;  %v3215_v48 = vor.u32 %v3615_v36, %v3214_v34  ;;  %v2835_v54 = vor.u32 %v3517_v45, %v2832_v46  ;;  %v3150_v27 = vld [vmem:[#allocation2 + $0x468] sm:$0xf]  ;;  %v3469_v32 = vld [vmem:[#allocation2 + $0x6c] sm:$0xf]  ;;  %v2640_v33 = vld [vmem:[#allocation2 + $0x78] sm:$0xf0] }
  0x85   :  { %1483 = vmatpush.bf16.msrb.mxu3 %v3039_v52  ;;  %v3611_v52 = vld [vmem:[#allocation2 + $0x4d4] sm:$0xf0]  ;;  %v3278_v29 = vld [vmem:[#allocation2 + $0x568] sm:$0xf]  ;;  %v3501_v34 = vld [vmem:[#allocation2 + $0x16c] sm:$0xf]  ;;  %v3151_v37 = vor.u32 %v3599_v28, %v3150_v27  ;;  %v2643_v40 = vor.u32 %v3469_v32, %v2640_v33 }
  0x86   :  { %v2768_v36 = vld [vmem:[#allocation2 + $0x178] sm:$0xf0]  ;;  %v3134_v41 = vld [vmem:[#allocation2 + $0x448] sm:$0xf]  ;;  %v3595_v42 = vld [vmem:[#allocation2 + $0x454] sm:$0xf0] }
  0x87   :  { %1442 = vmatpush.bf16.msrb.mxu0 %v2639_v59  ;;  %1456 = vmatpush.bf16.msrb.mxu1 %v2767_v60  ;;  %v3513_v59 = vld [vmem:[#allocation2 + $0x1cc] sm:$0xf]  ;;  %v2816_v60 = vld [vmem:[#allocation2 + $0x1d8] sm:$0xf0]  ;;  %v3627_v45 = vld [vmem:[#allocation2 + $0x554] sm:$0xf0] }
  0x88   :  { %1470 = vmatpush.bf16.msrb.mxu2 %v2895_v61  ;;  %v3199_v61 = vor.u32 %v3611_v52, %v3198_v51  ;;  %v2819_v3 = vor.u32 %v3513_v59, %v2816_v60  ;;  %v3465_v46 = vld [vmem:[#allocation2 + $0x4c] sm:$0xf]  ;;  %v3118_v53 = vld [vmem:[#allocation2 + $0x428] sm:$0xf]  ;;  %v3623_v58 = vld [vmem:[#allocation2 + $0x534] sm:$0xf0] }
  0x89   :  { %1484 = vmatpush.bf16.msrb.mxu3 %v3023_v1  ;;  %v3607_v1 = vld [vmem:[#allocation2 + $0x4b4] sm:$0xf0]  ;;  %v3246_v55 = vld [vmem:[#allocation2 + $0x528] sm:$0xf]  ;;  %v3461_v59 = vld [vmem:[#allocation2 + $0x2c] sm:$0xf] }
  0x8a   :  { %v2608_v60 = vld [vmem:[#allocation2 + $0x38] sm:$0xf0]  ;;  %v3247_v2 = vor.u32 %v3623_v58, %v3246_v55  ;;  %v3230_v4 = vld [vmem:[#allocation2 + $0x508] sm:$0xf]  ;;  %v3619_v5 = vld [vmem:[#allocation2 + $0x514] sm:$0xf0] }
  0x8b   :  { %1443 = vmatpush.bf16.msrb.mxu0 %v2623_v8  ;;  %1457 = vmatpush.bf16.msrb.mxu1 %v2751_v9  ;;  %v3509_v8 = vld [vmem:[#allocation2 + $0x1ac] sm:$0xf]  ;;  %v2800_v9 = vld [vmem:[#allocation2 + $0x1b8] sm:$0xf0] }
  0x8c   :  { %1471 = vmatpush.bf16.msrb.mxu2 %v2879_v10  ;;  %v3183_v10 = vor.u32 %v3607_v1, %v3182_v0  ;;  %v2803_v16 = vor.u32 %v3509_v8, %v2800_v9  ;;  %v3102_v0 = vld [vmem:[#allocation2 + $0x408] sm:$0xf]  ;;  %v3587_v1 = vld [vmem:[#allocation2 + $0x414] sm:$0xf0]  ;;  %v2592_v9 = vld [vmem:[#allocation2 + $0x18] sm:$0xf0] }
  0x8d   :  { %1485 = vmatpush.bf16.msrb.mxu3 %v3007_v14  ;;  %v3603_v14 = vld [vmem:[#allocation2 + $0x494] sm:$0xf0]  ;;  %v3072_v33 = vld [vmem:[#allocation2 + $0x3d8] sm:$0xf0]  ;;  %v3537_v58 = vld [vmem:[#allocation2 + $0x28c] sm:$0xf] }
  0x8e   :  { %v3167_v24 = vor.u32 %v3603_v14, %v3166_v13  ;;  %v2960_v13 = vld [vmem:[#allocation2 + $0x2f8] sm:$0xf0]  ;;  %v3581_v14 = vld [vmem:[#allocation2 + $0x3ec] sm:$0xf] }
  0x8f   :  { %1444 = vmatpush.bf16.msrb.mxu0 %v2607_v20  ;;  %1458 = vmatpush.bf16.msrb.mxu1 %v2735_v25  ;;  %v3505_v20 = vld [vmem:[#allocation2 + $0x18c] sm:$0xf]  ;;  %v3295_v25 = vor.u32 %v3635_v17, %v3294_v15  ;;  %v3103_v15 = vor.u32 %v3587_v1, %v3102_v0  ;;  %v3296_v1 = vld [vmem:[#allocation2 + $0x598] sm:$0xf0] }
  0x90   :  { %1472 = vmatpush.bf16.msrb.mxu2 %v2863_v26  ;;  %v2659_v26 = vor.u32 %v3473_v18, %v2656_v19  ;;  %v3613_v17 = vld [vmem:[#allocation2 + $0x4ec] sm:$0xf]  ;;  %v3216_v18 = vld [vmem:[#allocation2 + $0x4f8] sm:$0xf0]  ;;  %v3231_v19 = vor.u32 %v3619_v5, %v3230_v4 }
  0x91   :  { %1486 = vmatpush.bf16.msrb.mxu3 %v2991_v30  ;;  %v2787_v30 = vor.u32 %v3505_v20, %v2784_v21  ;;  %v2595_v20 = vor.u32 %v3457_v7, %v2592_v9  ;;  %v3645_v21 = vld [vmem:[#allocation2 + $0x5ec] sm:$0xf]  ;;  %v3219_v28 = vor.u32 %v3613_v17, %v3216_v18 }
  0x92   :  { %v3633_v0 = vld [vmem:[#allocation2 + $0x58c] sm:$0xf] }
  0x93   :  { %1445 = vmatpush.bf16.msrb.mxu0 %v2591_v38  ;;  %1459 = vmatpush.bf16.msrb.mxu1 %v2719_v43  ;;  %v3279_v38 = vor.u32 %v3631_v31, %v3278_v29  ;;  %v3262_v43 = vld [vmem:[#allocation2 + $0x548] sm:$0xf]  ;;  %v3545_v29 = vld [vmem:[#allocation2 + $0x2cc] sm:$0xf] }
  0x94   :  { %1473 = vmatpush.bf16.msrb.mxu2 %v2847_v44  ;;  %v2771_v44 = vor.u32 %v3501_v34, %v2768_v36  ;;  %v3263_v51 = vor.u32 %v3627_v45, %v3262_v43  ;;  %v3577_v31 = vld [vmem:[#allocation2 + $0x3cc] sm:$0xf]  ;;  %v3200_v36 = vld [vmem:[#allocation2 + $0x4d8] sm:$0xf0] }
  0x95   :  { %1487 = vmatpush.bf16.msrb.mxu3 %v2975_v47  ;;  %v2624_v47 = vld [vmem:[#allocation2 + $0x58] sm:$0xf0]  ;;  %v3609_v34 = vld [vmem:[#allocation2 + $0x4cc] sm:$0xf] }
  0x96   :  { %1446 = vmatmul.bf16.vlgmr.msrb.gmra.mxu0 %v3906_v57  ;;  %1460 = vmatmul.bf16.vlgmr.msrb.gmra.mxu1 %v3915_v6  ;;  %v2627_v52 = vor.u32 %v3465_v46, %v2624_v47  ;;  %v3203_v43 = vor.u32 %v3609_v34, %v3200_v36  ;;  %v3573_v45 = vld [vmem:[#allocation2 + $0x3ac] sm:$0xf]  ;;  %v3967_v46 = vld [vmem:[%s4575_s4] sm:$0xf]  ;;  %s2565_s4 = sshll.u32 %s4579_s8, 4  ;;  %s2566_s4 = int_to_ptr.hbm [resolvable:$true] %s2565_s4 }
  0x97   :  { %1494 = vmatpush.bf16.msra.mxu0 %v3215_v48  ;;  %1508 = vmatpush.bf16.msra.mxu1 %v3343_v49  ;;  %v3497_v48 = vld [vmem:[#allocation2 + $0x14c] sm:$0xf]  ;;  %v2752_v49 = vld [vmem:[#allocation2 + $0x158] sm:$0xf0] }
  0x98   :  { %1522 = vmatpush.bf16.msra.mxu2 %v2707_v50  ;;  %1488 = vmatmul.bf16.vlgmr.msrb.gmra.mxu3 %v3932_v23  ;;  %v3135_v50 = vor.u32 %v3595_v42, %v3134_v41  ;;  %v2755_v56 = vor.u32 %v3497_v48, %v2752_v49  ;;  %v3541_v41 = vld [vmem:[#allocation2 + $0x2ac] sm:$0xf]  ;;  %v3075_v42 = vor.u32 %v3577_v31, %v3072_v33  ;;  %v3056_v48 = vld [vmem:[#allocation2 + $0x3b8] sm:$0xf0] }
  0x99   :  { %1536 = vmatpush.bf16.msra.mxu3 %v2835_v54  ;;  %1474 = vmatmul.bf16.vlgmr.msrb.gmra.mxu2 %v3930_v22  ;;  %v3591_v54 = vld [vmem:[#allocation2 + $0x434] sm:$0xf0]  ;;  %v3605_v49 = vld [vmem:[#allocation2 + $0x4ac] sm:$0xf]  ;;  %v3059_v55 = vor.u32 %v3573_v45, %v3056_v48  ;;  %v3264_v31 = vld [vmem:[#allocation2 + $0x558] sm:$0xf0] }
  0x9a   :  { %v3533_v7 = vld [vmem:[#allocation2 + $0x26c] sm:$0xf]  ;;  %v3120_v45 = vld [vmem:[#allocation2 + $0x438] sm:$0xf0] }
  0x9b   :  { %1495 = vmatpush.bf16.msra.mxu0 %v3199_v61  ;;  %1509 = vmatpush.bf16.msra.mxu1 %v3327_v62  ;;  %v3493_v61 = vld [vmem:[#allocation2 + $0x12c] sm:$0xf]  ;;  %v2736_v62 = vld [vmem:[#allocation2 + $0x138] sm:$0xf0] }
  0x9c   :  { %1523 = vmatpush.bf16.msra.mxu2 %v2691_v63  ;;  %v3119_v63 = vor.u32 %v3591_v54, %v3118_v53  ;;  %v2739_v8 = vor.u32 %v3493_v61, %v2736_v62  ;;  %v302_v54 = vperm.slane %v3967_v46, 0  ;;  %v3040_v62 = vld [vmem:[#allocation2 + $0x398] sm:$0xf0]  ;;  %v3565_v9 = vld [vmem:[#allocation2 + $0x36c] sm:$0xf] }
  0x9d   :  { %1537 = vmatpush.bf16.msra.mxu3 %v2819_v3  ;;  %v2611_v3 = vor.u32 %v3461_v59, %v2608_v60  ;;  %v2912_v59 = vld [vmem:[#allocation2 + $0x298] sm:$0xf0]  ;;  %v3569_v60 = vld [vmem:[#allocation2 + $0x38c] sm:$0xf] }
  0x9e   :  { %v3043_v4 = vor.u32 %v3569_v60, %v3040_v62  ;;  %v3248_v48 = vld [vmem:[#allocation2 + $0x538] sm:$0xf0] }
  0x9f   :  { %1496 = vmatpush.bf16.msra.mxu0 %v3183_v10  ;;  %1510 = vmatpush.bf16.msra.mxu1 %v3311_v11  ;;  %v3489_v10 = vld [vmem:[#allocation2 + $0x10c] sm:$0xf]  ;;  %v2720_v11 = vld [vmem:[#allocation2 + $0x118] sm:$0xf0] }
  0xa0   :  { %1524 = vmatpush.bf16.msra.mxu2 %v2675_v12  ;;  %v3549_v12 = vld [vmem:[#allocation2 + $0x2ec] sm:$0xf]  ;;  %v2976_v60 = vld [vmem:[#allocation2 + $0x318] sm:$0xf0] }
  0xa1   :  { %1538 = vmatpush.bf16.msra.mxu3 %v2803_v16  ;;  %v3088_v16 = vld [vmem:[#allocation2 + $0x3f8] sm:$0xf0] }
  0xa2   :  { %v3091_v27 = vor.u32 %v3581_v14, %v3088_v16  ;;  %v3629_v14 = vld [vmem:[#allocation2 + $0x56c] sm:$0xf]  ;;  %v3104_v62 = vld [vmem:[#allocation2 + $0x418] sm:$0xf0] }
  0xa3   :  { %1497 = vmatpush.bf16.msra.mxu0 %v3167_v24  ;;  %1511 = vmatpush.bf16.msra.mxu1 %v3295_v25  ;;  %v3344_v24 = vld [vmem:[#allocation2 + $0x5f8] sm:$0xf0]  ;;  %v2723_v25 = vor.u32 %v3489_v10, %v2720_v11  ;;  %v3299_v10 = vor.u32 %v3633_v0, %v3296_v1  ;;  %v3617_v0 = vld [vmem:[#allocation2 + $0x50c] sm:$0xf] }
  0xa4   :  { %1525 = vmatpush.bf16.msra.mxu2 %v2659_v26  ;;  %v2963_v26 = vor.u32 %v3549_v12, %v2960_v13  ;;  %v3347_v32 = vor.u32 %v3645_v21, %v3344_v24  ;;  %v3024_v11 = vld [vmem:[#allocation2 + $0x378] sm:$0xf0]  ;;  %v3597_v12 = vld [vmem:[#allocation2 + $0x46c] sm:$0xf] }
  0xa5   :  { %1539 = vmatpush.bf16.msra.mxu3 %v2787_v30  ;;  %v2944_v30 = vld [vmem:[#allocation2 + $0x2d8] sm:$0xf0]  ;;  %v3529_v21 = vld [vmem:[#allocation2 + $0x24c] sm:$0xf] }
  0xa6   :  { %v3152_v13 = vld [vmem:[#allocation2 + $0x478] sm:$0xf0] }
  0xa7   :  { %1498 = vmatpush.bf16.msra.mxu0 %v3151_v37  ;;  %1512 = vmatpush.bf16.msra.mxu1 %v3279_v38  ;;  %v3641_v37 = vld [vmem:[#allocation2 + $0x5cc] sm:$0xf]  ;;  %v3328_v38 = vld [vmem:[#allocation2 + $0x5d8] sm:$0xf0] }
  0xa8   :  { %1526 = vmatpush.bf16.msra.mxu2 %v2643_v40  ;;  %v2947_v40 = vor.u32 %v3545_v29, %v2944_v30  ;;  %v3331_v47 = vor.u32 %v3641_v37, %v3328_v38  ;;  %v2880_v24 = vld [vmem:[#allocation2 + $0x258] sm:$0xf0]  ;;  %v3625_v30 = vld [vmem:[#allocation2 + $0x54c] sm:$0xf] }
  0xa9   :  { %1540 = vmatpush.bf16.msra.mxu3 %v2771_v44  ;;  %v2928_v44 = vld [vmem:[#allocation2 + $0x2b8] sm:$0xf0]  ;;  %v2883_v33 = vor.u32 %v3529_v21, %v2880_v24  ;;  %v3525_v38 = vld [vmem:[#allocation2 + $0x22c] sm:$0xf] }
  0xaa   :  { %v2931_v53 = vor.u32 %v3541_v41, %v2928_v44  ;;  %v3136_v29 = vld [vmem:[#allocation2 + $0x458] sm:$0xf0]  ;;  %v3557_v41 = vld [vmem:[#allocation2 + $0x32c] sm:$0xf] }
  0xab   :  { %1499 = vmatpush.bf16.msra.mxu0 %v3135_v50  ;;  %1513 = vmatpush.bf16.msra.mxu1 %v3263_v51  ;;  %v3184_v50 = vld [vmem:[#allocation2 + $0x4b8] sm:$0xf0]  ;;  %v3637_v51 = vld [vmem:[#allocation2 + $0x5ac] sm:$0xf] }
  0xac   :  { %1527 = vmatpush.bf16.msra.mxu2 %v2627_v52  ;;  %v3312_v52 = vld [vmem:[#allocation2 + $0x5b8] sm:$0xf0]  ;;  %v3589_v44 = vld [vmem:[#allocation2 + $0x42c] sm:$0xf] }
  0xad   :  { %1541 = vmatpush.bf16.msra.mxu3 %v2755_v56  ;;  %v3187_v56 = vor.u32 %v3605_v49, %v3184_v50  ;;  %v3315_v61 = vor.u32 %v3637_v51, %v3312_v52  ;;  %v3232_v1 = vld [vmem:[#allocation2 + $0x518] sm:$0xf0] }
  0xaf   :  { %1500 = vmatpush.bf16.msra.mxu0 %v3119_v63  ;;  %1514 = vmatpush.bf16.msra.mxu1 %v3247_v2  ;;  %v3601_v63 = vld [vmem:[#allocation2 + $0x48c] sm:$0xf] }
  0xb0   :  { %1528 = vmatpush.bf16.msra.mxu2 %v2611_v3  ;;  %v2915_v3 = vor.u32 %v3537_v58, %v2912_v59 }
  0xb1   :  { %1542 = vmatpush.bf16.msra.mxu3 %v2739_v8  ;;  %v2896_v8 = vld [vmem:[#allocation2 + $0x278] sm:$0xf0] }
  0xb2   :  { %v2899_v17 = vor.u32 %v3533_v7, %v2896_v8 }
  0xb3   :  { %1501 = vmatpush.bf16.msra.mxu0 %v3103_v15  ;;  %1515 = vmatpush.bf16.msra.mxu1 %v3231_v19  ;;  %v3280_v15 = vld [vmem:[#allocation2 + $0x578] sm:$0xf0]  ;;  %v1293_v16 = vpop.f32.mrf.mxu1  ;;  %v3027_v19 = vor.u32 %v3565_v9, %v3024_v11 }
  0xb4   :  { %1529 = vmatpush.bf16.msra.mxu2 %v2595_v20  ;;  %v3155_v20 = vor.u32 %v3597_v12, %v3152_v13 }
  0xb5   :  { %1543 = vmatpush.bf16.msra.mxu3 %v2723_v25  ;;  %v3561_v25 = vld [vmem:[#allocation2 + $0x34c] sm:$0xf] }
  0xb6   :  { %1502 = vmatmul.bf16.vlgmr.msra.gmra.mxu0 %v3948_v35  ;;  %1516 = vmatmul.bf16.vlgmr.msra.gmra.mxu1 %v3950_v39 }
  0xb7   :  { %1550 = vmatpush.bf16.msrb.mxu0 %v2963_v26  ;;  %1564 = vmatpush.bf16.msrb.mxu1 %v3091_v27  ;;  %v1279_v2 = vpop.f32.mrf.mxu0  ;;  %v3283_v26 = vor.u32 %v3629_v14, %v3280_v15  ;;  %v3008_v27 = vld [vmem:[#allocation2 + $0x358] sm:$0xf0] }
  0xb8   :  { %1578 = vmatpush.bf16.msrb.mxu2 %v3219_v28  ;;  %1544 = vmatmul.bf16.vlgmr.msra.gmra.mxu3 %v3915_v6  ;;  %v1280_v6 = vadd.f32 %v1279_v2, %v302_v54  ;;  %v3593_v28 = vld [vmem:[#allocation2 + $0x44c] sm:$0xf]  ;;  %v3011_v36 = vor.u32 %v3561_v25, %v3008_v27 }
  0xb9   :  { %1592 = vmatpush.bf16.msrb.mxu3 %v3347_v32  ;;  %1530 = vmatmul.bf16.vlgmr.msra.gmra.mxu2 %v3906_v57  ;;  %v3168_v57 = vld [vmem:[#allocation2 + $0x498] sm:$0xf0]  ;;  %v3139_v37 = vor.u32 %v3593_v28, %v3136_v29 }
  0xba   :  { %v3171_v5 = vor.u32 %v3601_v63, %v3168_v57  ;;  %v1294_v18 = vadd.f32 %v1293_v16, %v1280_v6 }
  0xbb   :  { %1551 = vmatpush.bf16.msrb.mxu0 %v2947_v40  ;;  %1565 = vmatpush.bf16.msrb.mxu1 %v3075_v42  ;;  %v2864_v40 = vld [vmem:[#allocation2 + $0x238] sm:$0xf0]  ;;  %v3267_v42 = vor.u32 %v3625_v30, %v3264_v31  ;;  %v1295_v49 = vpop.f32.mrf.mxu1  ;;  %v1321_v57 = vpop.f32.mrf.mxu3 }
  0xbc   :  { %1579 = vmatpush.bf16.msrb.mxu2 %v3203_v43  ;;  %v2992_v43 = vld [vmem:[#allocation2 + $0x338] sm:$0xf0]  ;;  %v2867_v50 = vor.u32 %v3525_v38, %v2864_v40 }
  0xbd   :  { %1593 = vmatpush.bf16.msrb.mxu3 %v3331_v47  ;;  %v3621_v47 = vld [vmem:[#allocation2 + $0x52c] sm:$0xf]  ;;  %v2995_v52 = vor.u32 %v3557_v41, %v2992_v43 }
  0xbe   :  { %v3251_v59 = vor.u32 %v3621_v47, %v3248_v48 }
  0xbf   :  { %1552 = vmatpush.bf16.msrb.mxu0 %v2931_v53  ;;  %1566 = vmatpush.bf16.msrb.mxu1 %v3059_v55  ;;  %v1281_v32 = vpop.f32.mrf.mxu0  ;;  %v3123_v53 = vor.u32 %v3589_v44, %v3120_v45  ;;  %v2848_v55 = vld [vmem:[#allocation2 + $0x218] sm:$0xf0] }
  0xc0   :  { %1580 = vmatpush.bf16.msrb.mxu2 %v3187_v56  ;;  %v1282_v34 = vadd.f32 %v1281_v32, %v302_v54  ;;  %v3521_v54 = vld [vmem:[#allocation2 + $0x20c] sm:$0xf] }
  0xc1   :  { %1594 = vmatpush.bf16.msrb.mxu3 %v3315_v61  ;;  %v3553_v56 = vld [vmem:[#allocation2 + $0x30c] sm:$0xf]  ;;  %v2851_v2 = vor.u32 %v3521_v54, %v2848_v55 }
  0xc2   :  { %v1296_v51 = vadd.f32 %v1295_v49, %v1282_v34  ;;  %v3585_v61 = vld [vmem:[#allocation2 + $0x40c] sm:$0xf]  ;;  %v2979_v6 = vor.u32 %v3553_v56, %v2976_v60 }
  0xc3   :  { %1553 = vmatpush.bf16.msrb.mxu0 %v2915_v3  ;;  %1567 = vmatpush.bf16.msrb.mxu1 %v3043_v4  ;;  %v3107_v4 = vor.u32 %v3585_v61, %v3104_v62  ;;  %v1323_v9 = vpop.f32.mrf.mxu3 }
  0xc4   :  { %1581 = vmatpush.bf16.msrb.mxu2 %v3171_v5  ;;  %v1307_v58 = vpop.f32.mrf.mxu2  ;;  %v3235_v5 = vor.u32 %v3617_v0, %v3232_v1 }
  0xc5   :  { %1595 = vmatpush.bf16.msrb.mxu3 %v3299_v10  ;;  %v1308_v63 = vadd.f32 %v1307_v58, %v1294_v18 }
  0xc7   :  { %1554 = vmatpush.bf16.msrb.mxu0 %v2899_v17  ;;  %1568 = vmatpush.bf16.msrb.mxu1 %v3027_v19  ;;  %v1322_v3 = vadd.f32 %v1321_v57, %v1308_v63 }
  0xc8   :  { %1582 = vmatpush.bf16.msrb.mxu2 %v3155_v20 }
  0xc9   :  { %1596 = vmatpush.bf16.msrb.mxu3 %v3283_v26 }
  0xcb   :  { %1555 = vmatpush.bf16.msrb.mxu0 %v2883_v33  ;;  %1569 = vmatpush.bf16.msrb.mxu1 %v3011_v36 }
  0xcc   :  { %1583 = vmatpush.bf16.msrb.mxu2 %v3139_v37  ;;  %v1309_v7 = vpop.f32.mrf.mxu2 }
  0xcd   :  { %1597 = vmatpush.bf16.msrb.mxu3 %v3267_v42  ;;  %v1310_v8 = vadd.f32 %v1309_v7, %v1296_v51 }
  0xcf   :  { %1556 = vmatpush.bf16.msrb.mxu0 %v2867_v50  ;;  %1570 = vmatpush.bf16.msrb.mxu1 %v2995_v52  ;;  %v1324_v10 = vadd.f32 %v1323_v9, %v1310_v8  ;;  %v304_v50 = vperm.slane %v3967_v46, 2 }
  0xd0   :  { %1584 = vmatpush.bf16.msrb.mxu2 %v3123_v53 }
  0xd1   :  { %1598 = vmatpush.bf16.msrb.mxu3 %v3251_v59 }
  0xd3   :  { %1557 = vmatpush.bf16.msrb.mxu0 %v2851_v2  ;;  %1571 = vmatpush.bf16.msrb.mxu1 %v2979_v6  ;;  %v1335_v11 = vpop.f32.mrf.mxu0  ;;  %v1349_v13 = vpop.f32.mrf.mxu1 }
  0xd4   :  { %1585 = vmatpush.bf16.msrb.mxu2 %v3107_v4  ;;  %v1336_v12 = vadd.f32 %v1335_v11, %v1322_v3 }
  0xd5   :  { %1599 = vmatpush.bf16.msrb.mxu3 %v3235_v5 }
  0xd6   :  { %1558 = vmatmul.bf16.vlgmr.msrb.gmra.mxu0 %v3930_v22  ;;  %1572 = vmatmul.bf16.vlgmr.msrb.gmra.mxu1 %v3932_v23  ;;  %v3978_v14 = vadd.f32 %v1349_v13, %v1336_v12  ;;  %v303_v22 = vperm.slane %v3967_v46, 1 }
  0xd7   :  { %1586 = vmatmul.bf16.vlgmr.msrb.gmra.mxu2 %v3948_v35 }
  0xd8   :  { %1600 = vmatmul.bf16.vlgmr.msrb.gmra.mxu3 %v3950_v39  ;;  %v3984_v24 = vmul.f32 0.70710677, %v3978_v14 }
  0xda   :  { %v1622_v27 = vmul.f32 %v3984_v24, %v3984_v24 }
  0xdb   :  { %v1337_v15 = vpop.f32.mrf.mxu0  ;;  %v1351_v17 = vpop.f32.mrf.mxu1 }
  0xdc   :  { %v1338_v16 = vadd.f32 %v1337_v15, %v1324_v10  ;;  %v1363_v19 = vpop.f32.mrf.mxu2  ;;  %v1377_v20 = vpop.f32.mrf.mxu3  ;;  %v3988_v30 = vmin.f32 %v1622_v27, 16.0 }
  0xdd   :  { %v1364_v21 = vadd.f32 %v1363_v19, %v303_v22 }
  0xde   :  { %v3980_v18 = vadd.f32 %v1351_v17, %v1338_v16  ;;  %v1635_v38 = vmul.f32 3.8918573e-05, %v3988_v30  ;;  %v1624_v6 = vmul.f32 2.1237322e-06, %v3988_v30 }
  0xdf   :  { %v1378_v26 = vadd.f32 %v1377_v20, %v1364_v21 }
  0xe0   :  { %v3991_v33 = vmul.f32 0.70710677, %v3980_v18  ;;  %v1636_v43 = vadd.f32 0.001143296, %v1635_v38  ;;  %v1625_v12 = vadd.f32 0.00028619796, %v1624_v6 }
  0xe2   :  { %v1782_v41 = vmul.f32 %v3991_v33, %v3991_v33  ;;  %v1637_v52 = vmul.f32 %v1636_v43, %v3988_v30 }
  0xe4   :  { %v1365_v23 = vpop.f32.mrf.mxu2  ;;  %v1379_v25 = vpop.f32.mrf.mxu3  ;;  %v3996_v48 = vmin.f32 %v1782_v41, 16.0  ;;  %v1638_v60 = vadd.f32 0.014752088, %v1637_v52 }
  0xe5   :  { %v1366_v31 = vadd.f32 %v1365_v23, %v303_v22  ;;  %v1626_v23 = vmul.f32 %v1625_v12, %v3988_v30 }
  0xe6   :  { %v1795_v55 = vmul.f32 3.8918573e-05, %v3996_v48  ;;  %v1639_v2 = vmul.f32 %v1638_v60, %v3988_v30 }
  0xe7   :  { %v1380_v40 = vadd.f32 %v1379_v25, %v1366_v31 }
  0xe8   :  { %v1796_v62 = vadd.f32 0.001143296, %v1795_v55  ;;  %v1640_v11 = vadd.f32 0.112945676, %v1639_v2 }
  0xea   :  { %v1797_v5 = vmul.f32 %v1796_v62, %v3996_v48  ;;  %v1641_v22 = vmul.f32 %v1640_v11, %v3988_v30 }
  0xec   :  { %v1798_v13 = vadd.f32 0.014752088, %v1797_v5 }
  0xf3   :  { %v1391_v35 = vpop.f32.mrf.mxu0  ;;  %v1405_v39 = vpop.f32.mrf.mxu1 }
  0xf4   :  { %v1392_v28 = vadd.f32 %v1391_v35, %v1378_v26  ;;  %v1799_v35 = vmul.f32 %v1798_v13, %v3996_v48 }
  0xf6   :  { %v1406_v34 = vadd.f32 %v1405_v39, %v1392_v28  ;;  %v1784_v28 = vmul.f32 2.1237322e-06, %v3996_v48 }
  0xfb   :  { %v1393_v32 = vpop.f32.mrf.mxu0  ;;  %v1407_v36 = vpop.f32.mrf.mxu1 }
  0xfc   :  { %v1419_v29 = vpop.f32.mrf.mxu2  ;;  %v1433_v37 = vpop.f32.mrf.mxu3  ;;  %v1394_v44 = vadd.f32 %v1393_v32, %v1380_v40  ;;  %v1642_v32 = vadd.f32 0.4994258, %v1641_v22 }
  0xfd   :  { %v1420_v42 = vadd.f32 %v1419_v29, %v1406_v34 }
  0xfe   :  { %v1408_v53 = vadd.f32 %v1407_v36, %v1394_v44  ;;  %v1627_v36 = vadd.f32 0.0036580483, %v1626_v23  ;;  %v1643_v44 = vmul.f32 %v1642_v32, %v3988_v30 }
  0xff   :  { %v3998_v49 = vadd.f32 %v1433_v37, %v1420_v42  ;;  %v1800_v37 = vadd.f32 0.112945676, %v1799_v35  ;;  %v1785_v42 = vadd.f32 0.00028619796, %v1784_v28 }
 0x100   :  { %v4042_v60 = vadd.f32 1.0, %v1643_v44 }
 0x101   :  { %v4004_v56 = vmul.f32 0.70710677, %v3998_v49 }
 0x102   :  { %3677 = vrcp.f32 %v4042_v60  ;;  %vm1650_vm1 = vweird.f32 %v4042_v60 }
 0x103   :  { %v1662_v63 = vmul.f32 %v4004_v56, %v4004_v56 }
 0x104   :  { %v1421_v45 = vpop.f32.mrf.mxu2  ;;  %v1435_v54 = vpop.f32.mrf.mxu3 }
 0x105   :  { %v1422_v59 = vadd.f32 %v1421_v45, %v1408_v53  ;;  %v4013_v7 = vmin.f32 %v1662_v63, 16.0 }
 0x107   :  { %v4008_v0 = vadd.f32 %v1435_v54, %v1422_v59  ;;  %v1675_v15 = vmul.f32 3.8918573e-05, %v4013_v7 }
 0x109   :  { %v4016_v10 = vmul.f32 0.70710677, %v4008_v0  ;;  %v1676_v39 = vadd.f32 0.001143296, %v1675_v15 }
 0x10b   :  { %v1822_v19 = vmul.f32 %v4016_v10, %v4016_v10  ;;  %v1677_v38 = vmul.f32 %v1676_v39, %v4013_v7 }
 0x10d   :  { %v4025_v29 = vmin.f32 %v1822_v19, 16.0  ;;  %v1678_v52 = vadd.f32 0.014752088, %v1677_v38 }
 0x10f   :  { %v1835_v43 = vmul.f32 3.8918573e-05, %v4025_v29  ;;  %v1679_v2 = vmul.f32 %v1678_v52, %v4013_v7 }
 0x111   :  { %v1836_v59 = vadd.f32 0.001143296, %v1835_v43  ;;  %v1680_v15 = vadd.f32 0.112945676, %v1679_v2 }
 0x113   :  { %v1447_v47 = vpop.f32.mrf.mxu0  ;;  %v1461_v51 = vpop.f32.mrf.mxu1  ;;  %v1681_v28 = vmul.f32 %v1680_v15, %v4013_v7 }
 0x114   :  { %v1448_v58 = vadd.f32 %v1447_v47, %v304_v50  ;;  %v1628_v47 = vmul.f32 %v1627_v36, %v3988_v30 }
 0x116   :  { %v1462_v57 = vadd.f32 %v1461_v51, %v1448_v58  ;;  %v1801_v51 = vmul.f32 %v1800_v37, %v3996_v48  ;;  %v1786_v58 = vmul.f32 %v1785_v42, %v3996_v48  ;;  %v1629_v63 = vadd.f32 0.05243302, %v1628_v47 }
 0x118   :  { %v1787_v6 = vadd.f32 0.0036580483, %v1786_v58 }
 0x11b   :  { %v1449_v1 = vpop.f32.mrf.mxu0  ;;  %v1463_v3 = vpop.f32.mrf.mxu1 }
 0x11c   :  { %v1475_v61 = vpop.f32.mrf.mxu2  ;;  %v1489_v4 = vpop.f32.mrf.mxu3  ;;  %v1450_v8 = vadd.f32 %v1449_v1, %v304_v50  ;;  %v1664_v1 = vmul.f32 2.1237322e-06, %v4013_v7 }
 0x11d   :  { %v1476_v9 = vadd.f32 %v1475_v61, %v1462_v57  ;;  %v1802_v57 = vadd.f32 0.4994258, %v1801_v51 }
 0x11e   :  { %v1464_v16 = vadd.f32 %v1463_v3, %v1450_v8  ;;  %v1665_v13 = vadd.f32 0.00028619796, %v1664_v1 }
 0x11f   :  { %v1490_v17 = vadd.f32 %v1489_v4, %v1476_v9  ;;  %v1837_v4 = vmul.f32 %v1836_v59, %v4025_v29  ;;  %v1630_v9 = vmul.f32 %v1629_v63, %v3988_v30  ;;  %v1803_v12 = vmul.f32 %v1802_v57, %v3996_v48 }
 0x121   :  { %v1838_v19 = vadd.f32 0.014752088, %v1837_v4  ;;  %v1631_v35 = vadd.f32 0.18741608, %v1630_v9 }
 0x123   :  { %v1839_v36 = vmul.f32 %v1838_v19, %v4025_v29 }
 0x124   :  { %v1477_v20 = vpop.f32.mrf.mxu2  ;;  %v1491_v31 = vpop.f32.mrf.mxu3 }
 0x125   :  { %v1478_v27 = vadd.f32 %v1477_v20, %v1464_v16 }
 0x127   :  { %v1492_v41 = vadd.f32 %v1491_v31, %v1478_v27  ;;  %v1666_v27 = vmul.f32 %v1665_v13, %v4013_v7  ;;  %v305_v31 = vperm.slane %v3967_v46, 3  ;;  %v1840_v46 = vadd.f32 0.112945676, %v1839_v36 }
 0x129   :  { %v1667_v44 = vadd.f32 0.0036580483, %v1666_v27 }
 0x133   :  { %v1503_v21 = vpop.f32.mrf.mxu0  ;;  %v1517_v26 = vpop.f32.mrf.mxu1 }
 0x134   :  { %v1504_v25 = vadd.f32 %v1503_v21, %v1490_v17  ;;  %v1788_v17 = vmul.f32 %v1787_v6, %v3996_v48  ;;  %v1841_v6 = vmul.f32 %v1840_v46, %v4025_v29 }
 0x136   :  { %v4027_v34 = vadd.f32 %v1517_v26, %v1504_v25  ;;  %v4064_v25 = vpop.eup %3677  ;;  %v4066_v26 = vadd.f32 1.0, %v1803_v12  ;;  %v1789_v32 = vadd.f32 0.05243302, %v1788_v17  ;;  %v1842_v27 = vadd.f32 0.4994258, %v1841_v6 }
 0x137   :  { %v1646_v42 = vmul.f32 %v4064_v25, %v4042_v60  ;;  %vm1651_vm0 = vweird.f32 %v4064_v25 }
 0x138   :  { %v4031_v40 = vmul.f32 0.70710677, %v4027_v34  ;;  %3679 = vrcp.f32 %v4066_v26  ;;  %v1843_v46 = vmul.f32 %v1842_v27, %v4025_v29  ;;  %vm4114_vm2 = vmor %vm1650_vm1, %vm1651_vm0  ;;  %vm1810_vm4 = vweird.f32 %v4066_v26 }
 0x13a   :  { %v1702_v45 = vmul.f32 %v4031_v40, %v4031_v40 }
 0x13b   :  { %v1505_v50 = vpop.f32.mrf.mxu0  ;;  %v1519_v55 = vpop.f32.mrf.mxu1 }
 0x13c   :  { %v4039_v53 = vmin.f32 %v1702_v45, 16.0  ;;  %v1506_v54 = vadd.f32 %v1505_v50, %v1492_v41  ;;  %v1531_v22 = vpop.f32.mrf.mxu2  ;;  %v1545_v21 = vpop.f32.mrf.mxu3  ;;  %v1632_v41 = vmul.f32 %v1631_v35, %v3988_v30  ;;  %v1682_v45 = vadd.f32 0.4994258, %v1681_v28 }
 0x13d   :  { %v1532_v47 = vadd.f32 %v1531_v22, %v305_v31  ;;  %v1790_v50 = vmul.f32 %v1789_v32, %v3996_v48  ;;  %v1656_v28 = vand.u32 2147483648, %v4042_v60 }
 0x13e   :  { %v1715_v61 = vmul.f32 3.8918573e-05, %v4039_v53  ;;  %v4045_v62 = vadd.f32 %v1519_v55, %v1506_v54  ;;  %v1647_v54 = vsub.f32 1.0, %v1646_v42  ;;  %v1824_v55 = vmul.f32 2.1237322e-06, %v4025_v29  ;;  %v4084_v4 = vpop.eup %3679 }
 0x13f   :  { %v1633_v59 = vadd.f32 1.1283791, %v1632_v41  ;;  %v1683_v63 = vmul.f32 %v1682_v45, %v4013_v7  ;;  %v1546_v57 = vadd.f32 %v1545_v21, %v1532_v47  ;;  %v1654_v21 = vand.u32 2147483647, %v4042_v60 }
 0x140   :  { %v1716_v3 = vadd.f32 0.001143296, %v1715_v61  ;;  %v4051_v5 = vmul.f32 0.70710677, %v4045_v62  ;;  %v1668_v61 = vmul.f32 %v1667_v44, %v4013_v7  ;;  %v1648_v12 = vmul.f32 %v4064_v25, %v1647_v54 }
 0x141   :  { %v1825_v13 = vadd.f32 0.00028619796, %v1824_v55  ;;  %v4089_v17 = vmul.f32 %v1633_v59, %v3984_v24  ;;  %v4091_v22 = vadd.f32 1.0, %v1683_v63  ;;  %vm4118_vm3 = vcmp.eq.f32.partialorder %v1654_v21, 8.507059e+37 }
 0x142   :  { %v1717_v8 = vmul.f32 %v1716_v3, %v4039_v53  ;;  %v1862_v11 = vmul.f32 %v4051_v5, %v4051_v5  ;;  %v1791_v3 = vadd.f32 0.18741608, %v1790_v50  ;;  %v1669_v19 = vadd.f32 0.05243302, %v1668_v61 }
 0x143   :  { %v1649_v24 = vadd.f32 %v4064_v25, %v1648_v12  ;;  %3681 = vrcp.f32 %v4091_v22  ;;  %v1657_v60 = vor.u32 1.1754944e-38, %v1656_v28  ;;  %vm1811_vm5 = vweird.f32 %v4084_v4 }
 0x144   :  { %v1718_v16 = vadd.f32 0.014752088, %v1717_v8  ;;  %v4060_v20 = vmin.f32 %v1862_v11, 16.0  ;;  %v1533_v58 = vpop.f32.mrf.mxu2  ;;  %v1547_v1 = vpop.f32.mrf.mxu3  ;;  %v1704_v8 = vmul.f32 2.1237322e-06, %v4039_v53  ;;  %v1792_v35 = vmul.f32 %v1791_v3, %v3996_v48  ;;  %vm4173_vm7 = vmor %vm1810_vm4, %vm1811_vm5 }
 0x145   :  { %v1670_v48 = vmul.f32 %v1669_v19, %v4013_v7  ;;  %v1653_v63 = vsel %vm4114_vm2, %v4064_v25, %v1649_v24  ;;  %vm1690_vm8 = vweird.f32 %v4091_v22 }
 0x146   :  { %v1719_v23 = vmul.f32 %v1718_v16, %v4039_v53  ;;  %v1875_v39 = vmul.f32 3.8918573e-05, %v4060_v20  ;;  %v1705_v32 = vadd.f32 0.00028619796, %v1704_v8  ;;  %v1793_v47 = vadd.f32 1.1283791, %v1792_v35 }
 0x147   :  { %v1814_v8 = vand.u32 2147483647, %v4066_v26 }
 0x148   :  { %v1876_v37 = vadd.f32 0.001143296, %v1875_v39  ;;  %v1720_v38 = vadd.f32 0.112945676, %v1719_v23  ;;  %v1534_v23 = vadd.f32 %v1533_v58, %v305_v31  ;;  %v1806_v39 = vmul.f32 %v4084_v4, %v4066_v26 }
 0x149   :  { %v1826_v31 = vmul.f32 %v1825_v13, %v4025_v29  ;;  %v4130_v3 = vmul.f32 %v1793_v47, %v3991_v33  ;;  %v4136_v12 = vpop.eup %3681  ;;  %v1658_v33 = vsel %vm4118_vm3, %v1657_v60, %v1653_v63  ;;  %vm4154_vm6 = vcmp.eq.f32.partialorder %v1814_v8, 8.507059e+37 }
 0x14a   :  { %v1877_v43 = vmul.f32 %v1876_v37, %v4060_v20  ;;  %v1721_v52 = vmul.f32 %v1720_v38, %v4039_v53  ;;  %v1548_v42 = vadd.f32 %v1547_v1, %v1534_v23  ;;  %v1807_v50 = vsub.f32 1.0, %v1806_v39 }
 0x14b   :  { %v1827_v59 = vadd.f32 0.0036580483, %v1826_v31  ;;  %v1864_v1 = vmul.f32 2.1237322e-06, %v4060_v20  ;;  %vm1691_vm9 = vweird.f32 %v4136_v12 }
 0x14c   :  { %v1878_v51 = vadd.f32 0.014752088, %v1877_v43  ;;  %v1722_v9 = vadd.f32 0.4994258, %v1721_v52  ;;  %v1808_v6 = vmul.f32 %v4084_v4, %v1807_v50  ;;  %vm4232_vm11 = vmor %vm1690_vm8, %vm1691_vm9 }
 0x14d   :  { %v1865_v35 = vadd.f32 0.00028619796, %v1864_v1 }
 0x14e   :  { %v1879_v30 = vmul.f32 %v1878_v51, %v4060_v20  ;;  %v1723_v36 = vmul.f32 %v1722_v9, %v4039_v53  ;;  %v1706_v51 = vmul.f32 %v1705_v32, %v4039_v53  ;;  %v4134_v9 = vadd.f32 1.0, %v1843_v46 }
 0x14f   :  { %v1809_v28 = vadd.f32 %v4084_v4, %v1808_v6  ;;  %v1686_v32 = vmul.f32 %v4136_v12, %v4091_v22  ;;  %v1866_v50 = vmul.f32 %v1865_v35, %v4060_v20 }
 0x150   :  { %v1880_v15 = vadd.f32 0.112945676, %v1879_v30  ;;  %v4108_v52 = vadd.f32 1.0, %v1723_v36  ;;  %v1707_v13 = vadd.f32 0.0036580483, %v1706_v51  ;;  %vm1850_vm0 = vweird.f32 %v4134_v9 }
 0x151   :  { %v1813_v46 = vsel %vm4173_vm7, %v4084_v4, %v1809_v28  ;;  %v1687_v51 = vsub.f32 1.0, %v1686_v32  ;;  %v1867_v8 = vadd.f32 0.0036580483, %v1866_v50 }
 0x152   :  { %v1881_v38 = vmul.f32 %v1880_v15, %v4060_v20  ;;  %3683 = vrcp.f32 %v4108_v52  ;;  %vm1730_vm14 = vweird.f32 %v4108_v52 }
 0x153   :  { %v1559_v2 = vpop.f32.mrf.mxu0  ;;  %v1573_v16 = vpop.f32.mrf.mxu1  ;;  %3685 = vrcp.f32 %v4134_v9  ;;  %v1868_v32 = vmul.f32 %v1867_v8, %v4060_v20 }
 0x154   :  { %v1560_v11 = vadd.f32 %v1559_v2, %v1546_v57  ;;  %v1882_v61 = vadd.f32 0.4994258, %v1881_v38  ;;  %v1671_v57 = vadd.f32 0.18741608, %v1670_v48  ;;  %v4162_v38 = vmul.f32 %v1658_v33, %v4089_v17 }
 0x156   :  { %v1574_v37 = vadd.f32 %v1573_v16, %v1560_v11  ;;  %v1828_v16 = vmul.f32 %v1827_v59, %v4025_v29  ;;  %v1883_v19 = vmul.f32 %v1882_v61, %v4060_v20  ;;  %v1672_v21 = vmul.f32 %v1671_v57, %v4013_v7 }
 0x157   :  { %v1708_v7 = vmul.f32 %v1707_v13, %v4039_v53  ;;  %v3348_v1 = vclamps-f32 %v4162_v38, 1.0  ;;  %v1688_v13 = vmul.f32 %v4136_v12, %v1687_v51 }
 0x158   :  { %v1829_v47 = vadd.f32 0.05243302, %v1828_v16 }
 0x159   :  { %v1709_v60 = vadd.f32 0.05243302, %v1708_v7  ;;  %v1689_v7 = vadd.f32 %v4136_v12, %v1688_v13 }
 0x15a   :  { %v1587_v41 = vpop.f32.mrf.mxu2  ;;  %v1830_v6 = vmul.f32 %v1829_v47, %v4025_v29 }
 0x15b   :  { %v1588_v43 = vadd.f32 %v1587_v41, %v1574_v37  ;;  %v1601_v44 = vpop.f32.mrf.mxu3  ;;  %v1561_v45 = vpop.f32.mrf.mxu0  ;;  %v1816_v37 = vand.u32 2147483648, %v4066_v26  ;;  %v4164_v41 = vadd.f32 1.0, %v1883_v19  ;;  %v4185_v26 = vmul.f32 0.5, %v3998_v49 }
 0x15c   :  { %v1562_v55 = vadd.f32 %v1561_v45, %v1548_v42  ;;  %v1575_v11 = vpop.f32.mrf.mxu1  ;;  %v1673_v45 = vadd.f32 1.1283791, %v1672_v21  ;;  %v1710_v16 = vmul.f32 %v1709_v60, %v4039_v53  ;;  %v1831_v28 = vadd.f32 0.18741608, %v1830_v6 }
 0x15d   :  { %v4110_v54 = vadd.f32 %v1601_v44, %v1588_v43  ;;  %v4169_v43 = vpop.eup %3683  ;;  %v1817_v58 = vor.u32 1.1754944e-38, %v1816_v37  ;;  %3687 = vrcp.f32 %v4164_v41  ;;  %v1869_v60 = vadd.f32 0.05243302, %v1868_v32 }
 0x15e   :  { %v1576_v15 = vadd.f32 %v1575_v11, %v1562_v55  ;;  %v4188_v61 = vpop.eup %3685  ;;  %v1726_v63 = vmul.f32 %v4169_v43, %v4108_v52  ;;  %v4203_v11 = vmul.f32 %v1673_v45, %v4004_v56  ;;  %v1711_v44 = vadd.f32 0.18741608, %v1710_v16 }
 0x15f   :  { %v4127_v2 = vmul.f32 0.70710677, %v4110_v54  ;;  %v4199_v49 = vsel %vm4154_vm6, %v1817_v58, %v1813_v46  ;;  %v1846_v33 = vmul.f32 %v4188_v61, %v4134_v9  ;;  %vm1731_vm12 = vweird.f32 %v4169_v43 }
 0x160   :  { %v1727_v21 = vsub.f32 1.0, %v1726_v63  ;;  %v1712_v13 = vmul.f32 %v1711_v44, %v4039_v53  ;;  %vm1851_vm13 = vweird.f32 %v4188_v61  ;;  %v1734_v53 = vand.u32 2147483647, %v4108_v52  ;;  %vm4262_vm15 = vmor %vm1730_vm14, %vm1731_vm12 }
 0x161   :  { %v1742_v25 = vmul.f32 %v4127_v2, %v4127_v2  ;;  %vm4283_vm3 = vmor %vm1850_vm0, %vm1851_vm13  ;;  %vm1890_vm5 = vweird.f32 %v4164_v41  ;;  %v1819_v50 = vmul.f32 %v4199_v49, %v4130_v3  ;;  %v1608_v49 = vmul.f32 0.5, %v4027_v34 }
 0x162   :  { %v1589_v23 = vpop.f32.mrf.mxu2  ;;  %vm1735_vm2 = vcmp.eq.f32.partialorder %v1734_v53, 8.507059e+37 }
 0x163   :  { %v4147_v39 = vmin.f32 %v1742_v25, 16.0  ;;  %v1590_v27 = vadd.f32 %v1589_v23, %v1576_v15  ;;  %v1603_v31 = vpop.f32.mrf.mxu3  ;;  %v1694_v23 = vand.u32 2147483647, %v4091_v22  ;;  %v4218_v37 = vpop.eup %3687 }
 0x164   :  { %vm1891_vm4 = vweird.f32 %v4218_v37 }
 0x165   :  { %v1744_v24 = vmul.f32 2.1237322e-06, %v4147_v39  ;;  %v4166_v48 = vadd.f32 %v1603_v31, %v1590_v27  ;;  %v1755_v42 = vmul.f32 3.8918573e-05, %v4147_v39  ;;  %v1696_v27 = vand.u32 2147483648, %v4091_v22  ;;  %vm4316_vm6 = vmor %vm1890_vm5, %vm1891_vm4 }
 0x166   :  { %vm4223_vm10 = vcmp.eq.f32.partialorder %v1694_v23, 8.507059e+37  ;;  %v1854_v22 = vand.u32 2147483647, %v4134_v9 }
 0x167   :  { %v1745_v17 = vadd.f32 0.00028619796, %v1744_v24  ;;  %v4182_v55 = vmul.f32 0.70710677, %v4166_v48  ;;  %v1756_v30 = vadd.f32 0.001143296, %v1755_v42 }
 0x168   :  { %v1847_v42 = vsub.f32 1.0, %v1846_v33  ;;  %v1697_v58 = vor.u32 1.1754944e-38, %v1696_v27  ;;  %vm4275_vm1 = vcmp.eq.f32.partialorder %v1854_v22, 8.507059e+37 }
 0x169   :  { %v1746_v59 = vmul.f32 %v1745_v17, %v4147_v39  ;;  %v1902_v4 = vmul.f32 %v4182_v55, %v4182_v55  ;;  %v1757_v57 = vmul.f32 %v1756_v30, %v4147_v39  ;;  %v1728_v17 = vmul.f32 %v4169_v43, %v1727_v21 }
 0x16a   :  { %v1848_v8 = vmul.f32 %v4188_v61, %v1847_v42 }
 0x16b   :  { %v4206_v25 = vmin.f32 %v1902_v4, 16.0  ;;  %v1758_v15 = vadd.f32 0.014752088, %v1757_v57  ;;  %v1747_v19 = vadd.f32 0.0036580483, %v1746_v59  ;;  %v1886_v59 = vmul.f32 %v4218_v37, %v4164_v41 }
 0x16c   :  { %v1693_v4 = vsel %vm4232_vm11, %v4136_v12, %v1689_v7  ;;  %v4243_v57 = vmul.f32 %v1831_v28, %v4025_v29  ;;  %v1729_v16 = vadd.f32 %v4169_v43, %v1728_v17  ;;  %v1736_v12 = vand.u32 2147483648, %v4108_v52 }
 0x16d   :  { %v1904_v35 = vmul.f32 2.1237322e-06, %v4206_v25  ;;  %v1759_v56 = vmul.f32 %v1758_v15, %v4147_v39  ;;  %v1915_v36 = vmul.f32 3.8918573e-05, %v4206_v25  ;;  %v1748_v45 = vmul.f32 %v1747_v19, %v4147_v39 }
 0x16e   :  { %v1870_v29 = vmul.f32 %v1869_v60, %v4060_v20  ;;  %v1887_v21 = vsub.f32 1.0, %v1886_v59  ;;  %v1698_v27 = vsel %vm4223_vm10, %v1697_v58, %v1693_v4  ;;  %v1849_v28 = vadd.f32 %v4188_v61, %v1848_v8 }
 0x16f   :  { %v1905_v24 = vadd.f32 0.00028619796, %v1904_v35  ;;  %v1760_v31 = vadd.f32 0.112945676, %v1759_v56  ;;  %v1916_v47 = vadd.f32 0.001143296, %v1915_v36 }
 0x170   :  { %v1749_v15 = vadd.f32 0.05243302, %v1748_v45  ;;  %v1737_v42 = vor.u32 1.1754944e-38, %v1736_v12  ;;  %v1871_v44 = vadd.f32 0.18741608, %v1870_v29  ;;  %v1888_v45 = vmul.f32 %v4218_v37, %v1887_v21 }
 0x171   :  { %v1906_v46 = vmul.f32 %v1905_v24, %v4206_v25  ;;  %v1761_v51 = vmul.f32 %v1760_v31, %v4147_v39  ;;  %v1917_v63 = vmul.f32 %v1916_v47, %v4206_v25  ;;  %v1713_v24 = vadd.f32 1.1283791, %v1712_v13 }
 0x172   :  { %v1750_v36 = vmul.f32 %v1749_v15, %v4147_v39  ;;  %v1733_v31 = vsel %vm4262_vm15, %v4169_v43, %v1729_v16  ;;  %v1856_v17 = vand.u32 2147483648, %v4134_v9  ;;  %v1699_v43 = vmul.f32 %v1698_v27, %v4203_v11  ;;  %v2075_v9 = vld [vmem:[%s4571_s0] sm:$0xff]  ;;  %v2077_v11 = vld [vmem:[%s4571_s0 + $0x10] sm:$0xff] }
 0x173   :  { %v1762_v6 = vadd.f32 0.4994258, %v1761_v51  ;;  %v1918_v33 = vadd.f32 0.014752088, %v1917_v63  ;;  %v1907_v19 = vadd.f32 0.0036580483, %v1906_v46  ;;  %v1738_v51 = vsel %vm1735_vm2, %v1737_v42, %v1733_v31 }
 0x174   :  { %v1751_v30 = vadd.f32 0.18741608, %v1750_v36  ;;  %v1853_v60 = vsel %vm4283_vm3, %v4188_v61, %v1849_v28  ;;  %v1714_v59 = vmul.f32 %v1713_v24, %v4031_v40  ;;  %v1872_v4 = vmul.f32 %v1871_v44, %v4060_v20  ;;  %v2076_v24 = vld [vmem:[%s4571_s0 + $0x8] sm:$0xff] }
 0x175   :  { %v1763_v23 = vmul.f32 %v1762_v6, %v4147_v39  ;;  %v1919_v35 = vmul.f32 %v1918_v33, %v4206_v25  ;;  %v1908_v52 = vmul.f32 %v1907_v19, %v4206_v25  ;;  %v1889_v22 = vadd.f32 %v4218_v37, %v1888_v45 }
 0x176   :  { %v3833_v61 = vmov 0   ;;  %v1857_v8 = vor.u32 1.1754944e-38, %v1856_v17  ;;  %v1739_v13 = vmul.f32 %v1738_v51, %v1714_v59  ;;  %v1894_v15 = vand.u32 2147483647, %v4164_v41 }
 0x177   :  { %v4257_v56 = vadd.f32 1.0, %v1763_v23  ;;  %v1920_v7 = vadd.f32 0.112945676, %v1919_v35  ;;  %v1909_v63 = vadd.f32 0.05243302, %v1908_v52  ;;  %3674 = vset.pattern.permute.xlu1 %v3833_v61  ;;  %3675 = vset.pattern.permute.xlu2 %v3833_v61  ;;  %v1896_v33 = vand.u32 2147483648, %v4164_v41 }
 0x178   :  { %2084 = vperm.xlu1 %3674, %v2075_v9   ;;  %2090 = vperm.xlu2 %3675, %v2077_v11   ;;  %v1752_v20 = vmul.f32 %v1751_v30, %v4147_v39  ;;  %v3349_v23 = vclamps-f32 %v1699_v43, 1.0  ;;  %v1833_v12 = vadd.f32 1.1283791, %v4243_v57  ;;  %v1858_v29 = vsel %vm4275_vm1, %v1857_v8, %v1853_v60 }
 0x179   :  { %3689 = vrcp.f32 %v4257_v56  ;;  %v1921_v47 = vmul.f32 %v1920_v7, %v4206_v25  ;;  %3676 = vset.pattern.permute.xlu0 %v3833_v61  ;;  %v1910_v39 = vmul.f32 %v1909_v63, %v4206_v25  ;;  %v1873_v41 = vadd.f32 1.1283791, %v1872_v4 }
 0x17a   :  { %v1893_v35 = vsel %vm4316_vm6, %v4218_v37, %v1889_v22  ;;  %vm1895_vm7 = vcmp.eq.f32.partialorder %v1894_v15, 8.507059e+37  ;;  %v1897_v57 = vor.u32 1.1754944e-38, %v1896_v33  ;;  %v3350_v27 = vclamps-f32 %v1739_v13, 1.0 }
 0x17b   :  { %v1922_v58 = vadd.f32 0.4994258, %v1921_v47  ;;  %v1776_v28 = vand.u32 2147483648, %v4257_v56  ;;  %v1753_v32 = vadd.f32 1.1283791, %v1752_v20  ;;  %v1942_v37 = vadd.f32 1.0, %v3348_v1 }
 0x17c   :  { %v1774_v7 = vand.u32 2147483647, %v4257_v56  ;;  %v1834_v31 = vmul.f32 %v1833_v12, %v4016_v10  ;;  %v1898_v52 = vsel %vm1895_vm7, %v1897_v57, %v1893_v35  ;;  %v1911_v42 = vadd.f32 0.18741608, %v1910_v39 }
 0x17d   :  { %v1923_v6 = vmul.f32 %v1922_v58, %v4206_v25  ;;  %v1943_v44 = vadd.f32 1.0, %v3349_v23  ;;  %v1874_v45 = vmul.f32 %v1873_v41, %v4051_v5  ;;  %vm1770_vm9 = vweird.f32 %v4257_v56 }
 0x17e   :  { %v1859_v17 = vmul.f32 %v1858_v29, %v1834_v31  ;;  %v1777_v43 = vor.u32 1.1754944e-38, %v1776_v28  ;;  %v1944_v46 = vadd.f32 1.0, %v3350_v27  ;;  %v1754_v10 = vmul.f32 %v1753_v32, %v4127_v2  ;;  %v2325_v31 = vld [vmem:[%s4572_s1 + $0x8] sm:$0xff] }
 0x17f   :  { %v3690_v40 = vpop.eup %3689  ;;  %v4308_v19 = vadd.f32 1.0, %v1923_v6  ;;  %v1899_v1 = vmul.f32 %v1898_v52, %v1874_v45  ;;  %vm1775_vm11 = vcmp.eq.f32.partialorder %v1774_v7, 8.507059e+37  ;;  %v1606_v30 = vmul.f32 0.5, %v3978_v14  ;;  %v4382_v52 = vld [vmem:[%s4572_s1 + $0x10] sm:$0xff] }
 0x180   :  { %v1766_v16 = vmul.f32 %v3690_v40, %v4257_v56  ;;  %vm1771_vm8 = vweird.f32 %v3690_v40  ;;  %2087 = vperm.xlu1 %3674, %v2076_v24   ;;  %v1912_v5 = vmul.f32 %v1911_v42, %v4206_v25  ;;  %v4342_v3 = vmul.f32 %v1943_v44, %v4185_v26  ;;  %v2327_v42 = vld [vmem:[%s4572_s1 + $0x18] sm:$0xff] }
 0x181   :  { %3691 = vrcp.f32 %v4308_v19  ;;  %vm1772_vm10 = vmor %vm1770_vm9, %vm1771_vm8  ;;  %v4345_v59 = vmul.f32 %v1942_v37, %v1606_v30  ;;  %v3352_v63 = vclamps-f32 %v1819_v50, 1.0  ;;  %v3353_v9 = vclamps-f32 %v1859_v17, 1.0 }
 0x182   :  { %v1767_v53 = vsub.f32 1.0, %v1766_v16  ;;  %v3354_v11 = vclamps-f32 %v1899_v1, 1.0  ;;  %v4347_v22 = vmul.f32 %v1944_v46, %v1608_v49  ;;  %v1936_v14 = vand.u32 2147483648, %v4308_v19 }
 0x183   :  { %v1913_v25 = vadd.f32 1.1283791, %v1912_v5  ;;  %v1934_v26 = vand.u32 2147483647, %v4308_v19  ;;  %v1958_v8 = vadd.f32 %v4342_v3, %v4345_v59  ;;  %v1611_v13 = vmul.f32 0.5, %v4008_v0  ;;  %v4402_v5 = vld [vmem:[%s4572_s1 + $0x28] sm:$0xff] }
 0x184   :  { %v1768_v36 = vmul.f32 %v3690_v40, %v1767_v53  ;;  %v1947_v15 = vadd.f32 1.0, %v3353_v9  ;;  %vm1930_vm13 = vweird.f32 %v4308_v19  ;;  %v1946_v20 = vadd.f32 1.0, %v3352_v63 }
 0x185   :  { %v1959_v23 = vadd.f32 %v1958_v8, %v4347_v22  ;;  %v1937_v12 = vor.u32 1.1754944e-38, %v1936_v14  ;;  %v1948_v29 = vadd.f32 1.0, %v3354_v11  ;;  %v1914_v21 = vmul.f32 %v1913_v25, %v4182_v55 }
 0x186   :  { %v1769_v47 = vadd.f32 %v3690_v40, %v1768_v36  ;;  %vm1935_vm15 = vcmp.eq.f32.partialorder %v1934_v26, 8.507059e+37  ;;  %v1610_v35 = vmul.f32 0.5, %v3980_v18  ;;  %v4359_v0 = vmul.f32 %v1947_v15, %v1611_v13  ;;  %v2078_v18 = vld [vmem:[%s4571_s0 + $0x18] sm:$0xff]  ;;  %v3412_v15 = vld [vmem:[#allocation8 + $0x60] sm:$0xf] }
 0x187   :  { %v3692_v38 = vpop.eup %3691  ;;  %v1612_v53 = vmul.f32 0.5, %v4045_v62  ;;  %v1613_v32 = vmul.f32 0.5, %v4166_v48  ;;  %2093 = vperm.xlu2 %3675, %v2078_v18   ;;  %v2079_v62 = vld [vmem:[%s4571_s0 + $0x20] sm:$0xff]  ;;  %v3834_v44 = vmov 512.0   ;;  %vm2476_vm0 = vcmp.ge.s32.totalorder %v2325_v31, 0 }
 0x188   :  { %v1773_v51 = vsel %vm1772_vm10, %v3690_v40, %v1769_v47  ;;  %v1926_v56 = vmul.f32 %v3692_v38, %v4308_v19  ;;  %vm1931_vm12 = vweird.f32 %v3692_v38  ;;  %v1609_v40 = vmul.f32 0.5, %v4110_v54  ;;  %v4373_v48 = vld [vmem:[%s4572_s1] sm:$0xff]  ;;  %v3404_v18 = vld [vmem:[#allocation8 + $0x48] sm:$0xf] }
 0x189   :  { %v1778_v58 = vsel %vm1775_vm11, %v1777_v43, %v1773_v51  ;;  %vm1932_vm14 = vmor %vm1930_vm13, %vm1931_vm12  ;;  %v1954_v57 = vmul.f32 %v1946_v20, %v1610_v35  ;;  %v1956_v27 = vmul.f32 %v1948_v29, %v1612_v53  ;;  %3693 = vrcp.f32 %v3834_v44  ;;  %v4391_v47 = vld [vmem:[%s4572_s1 + $0x20] sm:$0xff]  ;;  %v3660_v20 = vld [vmem:[#allocation8 + $0x64] sm:$0xf] }
 0x18a   :  { %v1779_v60 = vmul.f32 %v1778_v58, %v1754_v10  ;;  %v1927_v2 = vsub.f32 1.0, %v1926_v56  ;;  %v2482_v43 = vsel %vm2476_vm0, 1, %v3833_v61  ;;  %vm2478_vm2 = vcmp.ge.s32.totalorder %v2327_v42, 0  ;;  %v3661_v53 = vld [vmem:[#allocation8 + $0x6c] sm:$0xf] }
 0x18b   :  { %v1963_v55 = vadd.f32 %v4359_v0, %v1954_v57  ;;  %v2484_v1 = vsel %vm2478_vm2, 1, %v3833_v61  ;;  %vm2480_vm3 = vcmp.ge.s32.totalorder %v4402_v5, 0  ;;  %vm2218_vm6 = vcmask 523264  }
 0x18c   :  { %v3351_v4 = vclamps-f32 %v1779_v60, 1.0  ;;  %v1928_v6 = vmul.f32 %v3692_v38, %v1927_v2  ;;  %v2486_v2 = vsel %vm2480_vm3, 1, %v3833_v61  ;;  %vm2475_vm7 = vcmp.ge.s32.totalorder %v4373_v48, 0 }
 0x18d   :  { %v1964_v24 = vadd.f32 %v1963_v55, %v1956_v27  ;;  %v3658_v55 = vld [vmem:[#allocation8 + $0x4c] sm:$0xf0]  ;;  %vm2477_vm10 = vcmp.ge.s32.totalorder %v4382_v52, 0  ;;  %vm2479_vm11 = vcmp.ge.s32.totalorder %v4391_v47, 0 }
 0x18e   :  { %v1945_v34 = vadd.f32 1.0, %v3351_v4  ;;  %v1929_v33 = vadd.f32 %v3692_v38, %v1928_v6 }
 0x18f   :  { %2096 = vperm.xlu2 %3675, %v2079_v62   ;;  %v3694_v45 = vpop.eup %3693  ;;  %v3659_v62 = vld [vmem:[#allocation8 + $0x54] sm:$0xf0] }
 0x190   :  { %v1953_v16 = vmul.f32 %v1945_v34, %v1609_v40  ;;  %v1933_v54 = vsel %vm1932_vm14, %v3692_v38, %v1929_v33  ;;  %v1969_v50 = vmul.f32 512.0, %v3694_v45  ;;  %vm1973_vm1 = vweird.f32 %v3694_v45  ;;  %v3662_v33 = vld [vmem:[#allocation8 + $0x6c] sm:$0xf0] }
 0x191   :  { %v1938_v41 = vsel %vm1935_vm15, %v1937_v12, %v1933_v54  ;;  %v3414_v54 = vld [vmem:[#allocation8 + $0x70] sm:$0xf0]  ;;  %v3405_v44 = vor.u32 %v3659_v62, %v3404_v18 }
 0x192   :  { %v1960_v39 = vadd.f32 %v1959_v23, %v1953_v16  ;;  %v1939_v19 = vmul.f32 %v1938_v41, %v1914_v21  ;;  %v1970_v17 = vsub.f32 1.0, %v1969_v50  ;;  %v3413_v21 = vor.u32 %v3662_v33, %v3412_v15  ;;  %v3663_v41 = vld [vmem:[#allocation8 + $0x74] sm:$0xf0]  ;;  %v3406_v50 = vld [vmem:[#allocation8 + $0x58] sm:$0xf0] }
 0x193   :  { %v3417_v35 = vor.u32 %v3660_v20, %v3414_v54  ;;  %v3648_v15 = vld [vmem:[#allocation8 + $0x4] sm:$0xf]  ;;  %v3366_v33 = vld [vmem:[#allocation8 + $0x10] sm:$0xf0] }
 0x194   :  { %1961 = vadd.xlane.f32.xlu0 %v1960_v39  ;;  %v3355_v28 = vclamps-f32 %v1939_v19, 1.0  ;;  %v1971_v46 = vmul.f32 %v3694_v45, %v1970_v17  ;;  %v3420_v39 = vld [vmem:[#allocation8 + $0x68] sm:$0xf]  ;;  %v3422_v19 = vld [vmem:[#allocation8 + $0x78] sm:$0xf0]  ;;  %2232 = vmatpush.bf16.msra.mxu0 %v3413_v21  ;;  %v3369_v21 = vor.u32 %v3648_v15, %v3366_v33 }
 0x195   :  { %2256 = vmatpush.bf16.msra.mxu1 %v3417_v35 }
 0x196   :  { %v1949_v36 = vadd.f32 1.0, %v3355_v28  ;;  %v1972_v38 = vadd.f32 %v3694_v45, %v1971_v46  ;;  %v3654_v46 = vld [vmem:[#allocation8 + $0x2c] sm:$0xf0] }
 0x197   :  { %2331 = vperm.xlu2 %3675, %v4373_v48   ;;  %v2485_v48 = vsel %vm2479_vm11, 1, %v3833_v61 }
 0x198   :  { %v1957_v7 = vmul.f32 %v1949_v36, %v1613_v32  ;;  %v4396_v10 = vsel %vm1973_vm1, %v3694_v45, %v1972_v38  ;;  %v3425_v32 = vor.u32 %v3661_v53, %v3422_v19  ;;  %v3396_v36 = vld [vmem:[#allocation8 + $0x40] sm:$0xf]  ;;  %v3657_v45 = vld [vmem:[#allocation8 + $0x4c] sm:$0xf]  ;;  %v2481_v53 = vsel %vm2475_vm7, 1, %v3833_v61 }
 0x199   :  { %v3409_v17 = vor.u32 %v3657_v45, %v3406_v50 }
 0x19a   :  { %v1965_v37 = vadd.f32 %v1964_v24, %v1957_v7  ;;  %v3397_v24 = vor.u32 %v3658_v55, %v3396_v36  ;;  %2304 = vmatpush.bf16.msra.mxu3 %v3425_v32  ;;  %v2483_v36 = vsel %vm2477_vm10, 1, %v3833_v61 }
 0x19c   :  { %1966 = vadd.xlane.f32.xlu0 %v1965_v37  ;;  %v3398_v37 = vld [vmem:[#allocation8 + $0x50] sm:$0xf0]  ;;  %2233 = vmatpush.bf16.msra.mxu0 %v3397_v24 }
 0x19e   :  { %2305 = vmatpush.bf16.msra.mxu3 %v3409_v17 }
 0x19f   :  { %2334 = vperm.xlu2 %3675, %v2325_v31  }
 0x1a7   :  { %2337 = vperm.xlu2 %3675, %v4382_v52  }
 0x1af   :  { %2340 = vperm.xlu2 %3675, %v2327_v42  }
 0x1b7   :  { %2343 = vperm.xlu2 %3675, %v4391_v47  }
 0x1bf   :  { %2491 = vperm.xlu2 %3675, %v2482_v43   ;;  %v3380_v43 = vld [vmem:[#allocation8 + $0x20] sm:$0xf] }
 0x1c0   :  { %v3381_v38 = vor.u32 %v3654_v46, %v3380_v43 }
 0x1c2   :  { %2234 = vmatpush.bf16.msra.mxu0 %v3381_v38 }
 0x1c7   :  { %2497 = vperm.xlu2 %3675, %v2484_v1   ;;  %v3652_v1 = vld [vmem:[#allocation8 + $0x24] sm:$0xf] }
 0x1cf   :  { %2503 = vperm.xlu2 %3675, %v2486_v2   ;;  %v3653_v2 = vld [vmem:[#allocation8 + $0x2c] sm:$0xf] }
 0x1d2   :  { %v2091_v35 = vpop.permute.xlu2 %2090 }
 0x1e1   :  { %v2094_v19 = vpop.permute.xlu2 %2093 }
 0x1e9   :  { %v2097_v18 = vpop.permute.xlu2 %2096 }
 0x1ea   :  { %v2085_v23 = vpop.permute.xlu1 %2084 }
 0x1f1   :  { %v2332_v17 = vpop.permute.xlu2 %2331 }
 0x1f9   :  { %v2335_v33 = vpop.permute.xlu2 %2334 }
 0x207   :  { %v1962_v51 = vpop.xlane.xlu0 %1961 }
 0x208   :  { %v1975_v30 = vmul.f32 %v4396_v10, %v1962_v51  ;;  %v3382_v51 = vld [vmem:[#allocation8 + $0x30] sm:$0xf0] }
 0x20a   :  { %v4405_v58 = vsub.f32 %v4345_v59, %v1975_v30  ;;  %v4408_v56 = vsub.f32 %v4342_v3, %v1975_v30  ;;  %v4411_v49 = vsub.f32 %v4347_v22, %v1975_v30  ;;  %v4414_v60 = vsub.f32 %v1953_v16, %v1975_v30 }
 0x20b   :  { %v2081_v16 = vlaneseq  ;;  %v3385_v30 = vor.u32 %v3652_v1, %v3382_v51  ;;  %v2035_v51 = vld [vmem:[#allocation5] sm:$0xf] }
 0x20c   :  { %v1985_v63 = vmul.f32 %v4405_v58, %v4405_v58  ;;  %v1986_v9 = vmul.f32 %v4408_v56, %v4408_v56  ;;  %v1987_v59 = vmul.f32 %v4411_v49, %v4411_v49  ;;  %v1988_v4 = vmul.f32 %v4414_v60, %v4414_v60 }
 0x20d   :  { %v2040_v15 = vperm.slane %v2035_v51, 3 }
 0x20e   :  { %v1993_v3 = vadd.f32 %v1986_v9, %v1985_v63  ;;  %v3388_v63 = vld [vmem:[#allocation8 + $0x28] sm:$0xf]  ;;  %v3655_v9 = vld [vmem:[#allocation8 + $0x34] sm:$0xf0] }
 0x20f   :  { %v1967_v11 = vpop.xlane.xlu0 %1966 }
 0x210   :  { %v1994_v22 = vadd.f32 %v1993_v3, %v1987_v59  ;;  %v1976_v14 = vmul.f32 %v4396_v10, %v1967_v11  ;;  %v2088_v59 = vpop.permute.xlu1 %2087  ;;  %v3389_v3 = vor.u32 %v3655_v9, %v3388_v63  ;;  %v3390_v11 = vld [vmem:[#allocation8 + $0x38] sm:$0xf0]  ;;  %v2037_v9 = vperm.slane %v2035_v51, 0 }
 0x212   :  { %v1995_v25 = vadd.f32 %v1994_v22, %v1988_v4  ;;  %v4426_v6 = vsub.f32 %v1954_v57, %v1976_v14  ;;  %v4429_v26 = vsub.f32 %v4359_v0, %v1976_v14  ;;  %v4431_v40 = vsub.f32 %v1956_v27, %v1976_v14  ;;  %v3364_v4 = vld [vmem:[#allocation8] sm:$0xf]  ;;  %v3650_v22 = vld [vmem:[#allocation8 + $0xc] sm:$0xf0] }
 0x213   :  { %v4433_v34 = vsub.f32 %v1957_v7, %v1976_v14  ;;  %v3421_v0 = vor.u32 %v3663_v41, %v3420_v39  ;;  %v4441_v57 = vand.u32 127, %v2081_v16  ;;  %v3656_v7 = vld [vmem:[#allocation8 + $0x44] sm:$0xf]  ;;  %v3835_v14 = vmov 0.0   ;;  %v3372_v16 = vld [vmem:[#allocation8 + $0x8] sm:$0xf] }
 0x214   :  { %1996 = vadd.xlane.f32.xlu0 %v1995_v25  ;;  %v1989_v8 = vmul.f32 %v4426_v6, %v4426_v6  ;;  %v1990_v13 = vmul.f32 %v4429_v26, %v4429_v26  ;;  %v1991_v12 = vmul.f32 %v4431_v40, %v4431_v40  ;;  %v3401_v42 = vor.u32 %v3656_v7, %v3398_v37  ;;  %v3374_v39 = vld [vmem:[#allocation8 + $0x18] sm:$0xf0] }
 0x215   :  { %v1992_v27 = vmul.f32 %v4433_v34, %v4433_v34  ;;  %2280 = vmatpush.bf16.msra.mxu2 %v3421_v0  ;;  %vm2101_vm4 = vcmp.eq.s32.totalorder %v2085_v23, %v4441_v57  ;;  %vm2102_vm5 = vcmp.eq.s32.totalorder %v2088_v59, %v4441_v57  ;;  %v3365_v20 = vor.u32 %v3650_v22, %v3364_v4  ;;  %v2080_v0 = vld [vmem:[%s4571_s0 + $0x28] sm:$0xff]  ;;  %s3836_s0 = smov [#allocation10]  }
 0x216   :  { %v1998_v29 = vadd.f32 %v1990_v13, %v1989_v8  ;;  %2257 = vmatpush.bf16.msra.mxu1 %v3401_v42  ;;  %v3356_v25 = vsel %vm2101_vm4, 1.0, %v3835_v14  ;;  %v3393_v8 = vor.u32 %v3653_v2, %v3390_v11  ;;  %v3357_v13 = vsel %vm2102_vm5, 1.0, %v3835_v14  ;;  %s2563_s24 = sshll.u32 %s3836_s0, 4  ;;  %s2564_s24 = int_to_ptr.vmem [resolvable:$true] %s2563_s24 }
 0x217   :  { %v2119_v23 = vpack.c.bf16 %v3357_v13, %v3356_v25  ;;  %2235 = vmatpush.bf16.msra.mxu0 %v3365_v20  ;;  %vm2103_vm8 = vcmp.eq.s32.totalorder %v2091_v35, %v4441_v57  ;;  %vm2104_vm9 = vcmp.eq.s32.totalorder %v2094_v19, %v4441_v57  ;;  %vm2105_vm12 = vcmp.eq.s32.totalorder %v2097_v18, %v4441_v57  ;;  %v2053_v25 = vld [vmem:[#allocation7] sm:$0xf] }
 0x218   :  { %v1999_v28 = vadd.f32 %v1998_v29, %v1991_v12  ;;  %v3651_v12 = vld [vmem:[#allocation8 + $0x14] sm:$0xf0]  ;;  %v3649_v29 = vld [vmem:[#allocation8 + $0xc] sm:$0xf]  ;;  %2306 = vmatpush.bf16.msra.mxu3 %v3393_v8  ;;  %v3360_v50 = vsel %vm2105_vm12, 1.0, %v3835_v14  ;;  %v2038_v2 = vperm.slane %v2035_v51, 1  ;;  %vm2348_vm4 = vcmp.eq.s32.totalorder %v2332_v17, %v4441_v57 }
 0x219   :  { %2281 = vmatpush.bf16.msra.mxu2 %v3405_v44  ;;  %v3373_v54 = vor.u32 %v3651_v12, %v3372_v16  ;;  %v3377_v41 = vor.u32 %v3649_v29, %v3374_v39  ;;  %v2039_v59 = vperm.slane %v2035_v51, 2  ;;  %v2055_v20 = vperm.slane %v2053_v25, 0 }
 0x21a   :  { %v2000_v31 = vadd.f32 %v1999_v28, %v1992_v27  ;;  %2258 = vmatpush.bf16.msra.mxu1 %v3385_v30  ;;  %3426 = vmatmul.msk.bf16.vlgmr.msra.gmra.mxu0 %vm2218_vm6, %v2119_v23  ;;  %v3358_v27 = vsel %vm2103_vm8, 1.0, %v3835_v14  ;;  %v3359_v28 = vsel %vm2104_vm9, 1.0, %v3835_v14  ;;  %v2056_v16 = vperm.slane %v2053_v25, 1 }
 0x21b   :  { %v2120_v32 = vpack.c.bf16 %v3359_v28, %v3358_v27  ;;  %v2057_v12 = vperm.slane %v2053_v25, 2  ;;  %v2058_v35 = vperm.slane %v2053_v25, 3  ;;  %vm2349_vm5 = vcmp.eq.s32.totalorder %v2335_v33, %v4441_v57 }
 0x21c   :  { %2001 = vadd.xlane.f32.xlu1 %v2000_v31  ;;  %2307 = vmatpush.bf16.msra.mxu3 %v3377_v41 }
 0x21d   :  { %2282 = vmatpush.bf16.msra.mxu2 %v3389_v3 }
 0x21e   :  { %2259 = vmatpush.bf16.msra.mxu1 %v3369_v21 }
 0x21f   :  { %3435 = vmatmul.msk.bf16.vlgmr.msra.gmra.mxu3 %vm2218_vm6, %v2119_v23 }
 0x221   :  { %2283 = vmatpush.bf16.msra.mxu2 %v3373_v54  ;;  %3429 = vmatmul.msk.bf16.vlgmr.msra.gmra.mxu1 %vm2218_vm6, %v2119_v23 }
 0x224   :  { %3432 = vmatmul.msk.bf16.vlgmr.msra.gmra.mxu2 %vm2218_vm6, %v2119_v23 }
 0x228   :  { %2099 = vperm.xlu0 %3676, %v2080_v0  }
 0x22a   :  { %3427 = vmatmul.msk.bf16.gmra.mxu0 %vm2218_vm6, %v2120_v32 }
 0x22f   :  { %3436 = vmatmul.msk.bf16.gmra.mxu3 %vm2218_vm6, %v2120_v32 }
 0x230   :  { %2488 = vperm.xlu0 %3676, %v2481_v53  }
 0x231   :  { %3430 = vmatmul.msk.bf16.gmra.mxu1 %vm2218_vm6, %v2120_v32 }
 0x234   :  { %3433 = vmatmul.msk.bf16.gmra.mxu2 %vm2218_vm6, %v2120_v32 }
 0x235   :  { %2346 = vperm.xlu1 %3674, %v4402_v5  }
 0x238   :  { %2494 = vperm.xlu0 %3676, %v2483_v36  }
 0x240   :  { %2500 = vperm.xlu0 %3676, %v2485_v48  }
 0x287   :  { %v1997_v52 = vpop.xlane.xlu0 %1996 }
 0x288   :  { %v2003_v55 = vmul.f32 %v1997_v52, %v4396_v10  ;;  %v3439_v52 = vsel %vm2349_vm5, 1.0, %v3835_v14 }
 0x28a   :  { %v2005_v7 = vadd.f32 1e-05, %v2003_v55 }
 0x28c   :  { %3695 = vrsqrt.f32 %v2005_v7  ;;  %vm2013_vm15 = vweird.f32 %v2005_v7 }
 0x28f   :  { %v2002_v5 = vpop.xlane.xlu1 %2001 }
 0x290   :  { %v2004_v24 = vmul.f32 %v2002_v5, %v4396_v10 }
 0x292   :  { %v3696_v37 = vpop.eup %3695  ;;  %v2006_v31 = vadd.f32 1e-05, %v2004_v24 }
 0x293   :  { %v2008_v62 = vmul.f32 %v3696_v37, %v2005_v7  ;;  %vm2014_vm14 = vweird.f32 %v3696_v37 }
 0x294   :  { %3697 = vrsqrt.f32 %v2006_v31  ;;  %vm2015_vm0 = vmor %vm2013_vm15, %vm2014_vm14  ;;  %vm2023_vm2 = vweird.f32 %v2006_v31 }
 0x295   :  { %v2009_v42 = vmul.f32 %v3696_v37, %v2008_v62 }
 0x297   :  { %v2010_v47 = vmul.f32 0.5, %v2009_v42 }
 0x299   :  { %v2011_v44 = vsub.f32 1.5, %v2010_v47 }
 0x29a   :  { %v2100_v61 = vpop.permute.xlu0 %2099  ;;  %v3698_v45 = vpop.eup %3697 }
 0x29b   :  { %vm2106_vm13 = vcmp.eq.s32.totalorder %v2100_v61, %v4441_v57  ;;  %v2012_v43 = vmul.f32 %v3696_v37, %v2011_v44  ;;  %v2018_v10 = vmul.f32 %v3698_v45, %v2006_v31  ;;  %vm2024_vm1 = vweird.f32 %v3698_v45 }
 0x29c   :  { %v3361_v46 = vsel %vm2106_vm13, 1.0, %v3835_v14  ;;  %vm2025_vm3 = vmor %vm2023_vm2, %vm2024_vm1 }
 0x29d   :  { %v2121_v38 = vpack.c.bf16 %v3361_v46, %v3360_v50  ;;  %v2019_v1 = vmul.f32 %v3698_v45, %v2018_v10  ;;  %v2016_v30 = vsel %vm2015_vm0, %v3696_v37, %v2012_v43  ;;  %v2338_v37 = vpop.permute.xlu2 %2337  ;;  %v2237_v43 = vpop.f32.mrf.mxu0 }
 0x29e   :  { %v2027_v3 = vmul.f32 %v2016_v30, %v4405_v58  ;;  %v2028_v11 = vmul.f32 %v2016_v30, %v4408_v56  ;;  %v2029_v4 = vmul.f32 %v2016_v30, %v4411_v49  ;;  %v2030_v8 = vmul.f32 %v2016_v30, %v4414_v60  ;;  %v2261_v10 = vpop.f32.mrf.mxu1 }
 0x29f   :  { %3428 = vmatmul.msk.bf16.gmra.mxu0 %vm2218_vm6, %v2121_v38  ;;  %3431 = vmatmul.msk.bf16.gmra.mxu1 %vm2218_vm6, %v2121_v38  ;;  %v2020_v63 = vmul.f32 0.5, %v2019_v1  ;;  %vm2350_vm7 = vcmp.eq.s32.totalorder %v2338_v37, %v4441_v57 }
 0x2a0   :  { %3434 = vmatmul.msk.bf16.gmra.mxu2 %vm2218_vm6, %v2121_v38  ;;  %3437 = vmatmul.msk.bf16.gmra.mxu3 %vm2218_vm6, %v2121_v38  ;;  %v2045_v21 = vmul.f32 %v2037_v9, %v2027_v3  ;;  %v2046_v54 = vmul.f32 %v2038_v2, %v2028_v11  ;;  %v2047_v58 = vmul.f32 %v2039_v59, %v2029_v4  ;;  %vm2369_vm6 = vcmask 130048  }
 0x2a1   :  { %v2021_v22 = vsub.f32 1.5, %v2020_v63  ;;  %v2048_v41 = vmul.f32 %v2040_v15, %v2030_v8  ;;  %v3440_v31 = vsel %vm2350_vm7, 1.0, %v3835_v14 }
 0x2a2   :  { %v2063_v19 = vadd.f32 %v2055_v20, %v2045_v21  ;;  %v2064_v27 = vadd.f32 %v2056_v16, %v2046_v54  ;;  %v2065_v36 = vadd.f32 %v2057_v12, %v2047_v58  ;;  %v2309_v38 = vpop.f32.mrf.mxu3 }
 0x2a3   :  { %v2022_v13 = vmul.f32 %v3698_v45, %v2021_v22  ;;  %v2066_v48 = vadd.f32 %v2058_v35, %v2048_v41 }
 0x2a5   :  { %v2026_v29 = vsel %vm2025_vm3, %v3698_v45, %v2022_v13  ;;  %v2341_v62 = vpop.permute.xlu2 %2340  ;;  %v2239_v1 = vpop.f32.mrf.mxu0 }
 0x2a6   :  { %v2031_v56 = vmul.f32 %v2026_v29, %v4426_v6  ;;  %v2032_v49 = vmul.f32 %v2026_v29, %v4429_v26  ;;  %v2033_v39 = vmul.f32 %v2026_v29, %v4431_v40  ;;  %v2034_v60 = vmul.f32 %v2026_v29, %v4433_v34  ;;  %v2263_v51 = vpop.f32.mrf.mxu1 }
 0x2a7   :  { %v3438_v40 = vsel %vm2348_vm4, 1.0, %v3835_v14  ;;  %vm2351_vm8 = vcmp.eq.s32.totalorder %v2341_v62, %v4441_v57  ;;  %v2347_v44 = vpop.permute.xlu1 %2346  ;;  %v2285_v46 = vpop.f32.mrf.mxu2 }
 0x2a8   :  { %v2049_v23 = vmul.f32 %v2037_v9, %v2031_v56  ;;  %v2050_v0 = vmul.f32 %v2038_v2, %v2032_v49  ;;  %v2051_v53 = vmul.f32 %v2039_v59, %v2033_v39  ;;  %v2052_v28 = vmul.f32 %v2040_v15, %v2034_v60 }
 0x2a9   :  { %v2366_v18 = vpack.c.bf16 %v3439_v52, %v3438_v40  ;;  %v3441_v42 = vsel %vm2351_vm8, 1.0, %v3835_v14  ;;  %vm2353_vm9 = vcmp.eq.s32.totalorder %v2347_v44, %v4441_v57 }
 0x2aa   :  { %v2067_v32 = vadd.f32 %v2055_v20, %v2049_v23  ;;  %v2068_v6 = vadd.f32 %v2056_v16, %v2050_v0  ;;  %v2069_v26 = vadd.f32 %v2057_v12, %v2051_v53  ;;  %v2070_v34 = vadd.f32 %v2058_v35, %v2052_v28  ;;  %v2311_v30 = vpop.f32.mrf.mxu3  ;;  %v2489_v20 = vpop.permute.xlu0 %2488 }
 0x2ab   :  { %v2367_v47 = vpack.c.bf16 %v3441_v42, %v3440_v31  ;;  %v3443_v45 = vsel %vm2353_vm9, 1.0, %v3835_v14  ;;  %vm2505_vm11 = vcmp.eq.s32.totalorder %v2489_v20, 1 }
 0x2ac   :  { %v2071_v55 = vpack.c.bf16 %v2067_v32, %v2063_v19  ;;  %v2072_v7 = vpack.c.bf16 %v2068_v6, %v2064_v27  ;;  %v2073_v5 = vpack.c.bf16 %v2069_v26, %v2065_v36  ;;  %v2074_v24 = vpack.c.bf16 %v2070_v34, %v2066_v48 }
 0x2ad   :  { %v2344_v61 = vpop.permute.xlu2 %2343  ;;  %v2242_v63 = vpop.f32.mrf.mxu0 }
 0x2ae   :  { %2386 = vmatpush.bf16.msrb.mxu0 %v2071_v55  ;;  %2410 = vmatpush.bf16.msrb.mxu1 %v2072_v7  ;;  %vm2352_vm10 = vcmp.eq.s32.totalorder %v2344_v61, %v4441_v57  ;;  %v2266_v9 = vpop.f32.mrf.mxu1 }
 0x2af   :  { %2434 = vmatpush.bf16.msrb.mxu2 %v2073_v5  ;;  %2458 = vmatpush.bf16.msrb.mxu3 %v2074_v24  ;;  %v3442_v50 = vsel %vm2352_vm10, 1.0, %v3835_v14  ;;  %v2287_v57 = vpop.f32.mrf.mxu2 }
 0x2b0   :  { %v2368_v17 = vpack.c.bf16 %v3443_v45, %v3442_v50 }
 0x2b1   :  { %3444 = vmatmul.msk.bf16.vlgmr.msrb.gmra.mxu0 %vm2369_vm6, %v2366_v18  ;;  %3447 = vmatmul.msk.bf16.vlgmr.msrb.gmra.mxu1 %vm2369_vm6, %v2366_v18 }
 0x2b2   :  { %3450 = vmatmul.msk.bf16.vlgmr.msrb.gmra.mxu2 %vm2369_vm6, %v2366_v18  ;;  %3453 = vmatmul.msk.bf16.vlgmr.msrb.gmra.mxu3 %vm2369_vm6, %v2366_v18  ;;  %v2314_v2 = vpop.f32.mrf.mxu3  ;;  %v2495_v32 = vpop.permute.xlu0 %2494 }
 0x2b3   :  { %vm2507_vm13 = vcmp.eq.s32.totalorder %v2495_v32, 1 }
 0x2b5   :  { %v2244_v59 = vpop.f32.mrf.mxu0  ;;  %v2492_v49 = vpop.permute.xlu2 %2491 }
 0x2b6   :  { %v2268_v3 = vpop.f32.mrf.mxu1  ;;  %vm2506_vm12 = vcmp.eq.s32.totalorder %v2492_v49, 1 }
 0x2b7   :  { %v2290_v14 = vpop.f32.mrf.mxu2 }
 0x2ba   :  { %v4517_v4 = vpop.f32.mrf.mxu3 }
 0x2bd   :  { %v2498_v24 = vpop.permute.xlu2 %2497 }
 0x2be   :  { %vm2508_vm14 = vcmp.eq.s32.totalorder %v2498_v24, 1 }
 0x2bf   :  { %v4515_v11 = vpop.f32.mrf.mxu2 }
 0x2c1   :  { %3445 = vmatmul.msk.bf16.gmra.mxu0 %vm2369_vm6, %v2367_v47  ;;  %3448 = vmatmul.msk.bf16.gmra.mxu1 %vm2369_vm6, %v2367_v47 }
 0x2c2   :  { %3451 = vmatmul.msk.bf16.gmra.mxu2 %vm2369_vm6, %v2367_v47  ;;  %3454 = vmatmul.msk.bf16.gmra.mxu3 %vm2369_vm6, %v2367_v47 }
 0x2d1   :  { %3446 = vmatmul.msk.bf16.gmra.mxu0 %vm2369_vm6, %v2368_v17  ;;  %3449 = vmatmul.msk.bf16.gmra.mxu1 %vm2369_vm6, %v2368_v17 }
 0x2d2   :  { %3452 = vmatmul.msk.bf16.gmra.mxu2 %vm2369_vm6, %v2368_v17  ;;  %3455 = vmatmul.msk.bf16.gmra.mxu3 %vm2369_vm6, %v2368_v17  ;;  %v2501_v17 = vpop.permute.xlu0 %2500 }
 0x2d3   :  { %vm2509_vm15 = vcmp.eq.s32.totalorder %v2501_v17, 1 }
 0x31c   :  { %v4519_v22 = vpop.f32.mrf.mxu0  ;;  %v4521_v25 = vpop.f32.mrf.mxu1 }
 0x323   :  { %v4523_v8 = vpop.f32.mrf.mxu2  ;;  %v4525_v13 = vpop.f32.mrf.mxu3 }
 0x324   :  { %v4527_v15 = vpop.f32.mrf.mxu0  ;;  %v4529_v33 = vpop.f32.mrf.mxu1 }
 0x32b   :  { %v4531_v16 = vpop.f32.mrf.mxu2  ;;  %v4533_v12 = vpop.f32.mrf.mxu3 }
 0x32e   :  { %v2388_v29 = vpop.f32.mrf.mxu0  ;;  %v2412_v21 = vpop.f32.mrf.mxu1 }
 0x32f   :  { %v2511_v54 = vsel %vm2505_vm11, %v2388_v29, %v2237_v43  ;;  %v2512_v58 = vsel %vm2505_vm11, %v2412_v21, %v2261_v10 }
 0x330   :  { %v2535_v56 = vpack.c.bf16 %v2512_v58, %v2511_v54 }
 0x332   :  { %2547 = vst [vmem:[#allocation10] sm:$0xff] %v2535_v56 }
 0x335   :  { %v2436_v39 = vpop.f32.mrf.mxu2  ;;  %v2460_v60 = vpop.f32.mrf.mxu3 }
 0x336   :  { %v2513_v41 = vsel %vm2505_vm11, %v2436_v39, %v2285_v46  ;;  %v2514_v35 = vsel %vm2505_vm11, %v2460_v60, %v2309_v38  ;;  %v2390_v23 = vpop.f32.mrf.mxu0  ;;  %v2414_v0 = vpop.f32.mrf.mxu1 }
 0x337   :  { %v2536_v53 = vpack.c.bf16 %v2514_v35, %v2513_v41  ;;  %v2515_v19 = vsel %vm2506_vm12, %v2390_v23, %v2239_v1  ;;  %v2516_v27 = vsel %vm2506_vm12, %v2414_v0, %v2263_v51 }
 0x338   :  { %v2537_v28 = vpack.c.bf16 %v2516_v27, %v2515_v19 }
 0x339   :  { %2548 = vst [vmem:[#allocation10 + $0x8] sm:$0xff] %v2536_v53 }
 0x33a   :  { %2549 = vst [vmem:[#allocation10 + $0x10] sm:$0xff] %v2537_v28 }
 0x33d   :  { %v2438_v6 = vpop.f32.mrf.mxu2  ;;  %v2462_v36 = vpop.f32.mrf.mxu3 }
 0x33e   :  { %v2517_v26 = vsel %vm2506_vm12, %v2438_v6, %v2287_v57  ;;  %v2518_v40 = vsel %vm2506_vm12, %v2462_v36, %v2311_v30  ;;  %v2393_v48 = vpop.f32.mrf.mxu0  ;;  %v2417_v34 = vpop.f32.mrf.mxu1 }
 0x33f   :  { %v2538_v52 = vpack.c.bf16 %v2518_v40, %v2517_v26  ;;  %v2519_v55 = vsel %vm2507_vm13, %v2393_v48, %v2242_v63  ;;  %v2520_v7 = vsel %vm2507_vm13, %v2417_v34, %v2266_v9 }
 0x340   :  { %v2539_v5 = vpack.c.bf16 %v2520_v7, %v2519_v55 }
 0x341   :  { %2550 = vst [vmem:[#allocation10 + $0x18] sm:$0xff] %v2538_v52 }
 0x342   :  { %2551 = vst [vmem:[#allocation10 + $0x20] sm:$0xff] %v2539_v5 }
 0x345   :  { %v2441_v37 = vpop.f32.mrf.mxu2  ;;  %v2465_v18 = vpop.f32.mrf.mxu3 }
 0x346   :  { %v2521_v62 = vsel %vm2507_vm13, %v2441_v37, %v2290_v14  ;;  %v2522_v31 = vsel %vm2507_vm13, %v2465_v18, %v2314_v2  ;;  %v2395_v42 = vpop.f32.mrf.mxu0  ;;  %v2419_v47 = vpop.f32.mrf.mxu1 }
 0x347   :  { %v2540_v44 = vpack.c.bf16 %v2522_v31, %v2521_v62  ;;  %v2523_v61 = vsel %vm2508_vm14, %v2395_v42, %v2244_v59  ;;  %v2524_v45 = vsel %vm2508_vm14, %v2419_v47, %v2268_v3  ;;  %v2504_v14 = vpop.permute.xlu2 %2503 }
 0x348   :  { %v2541_v50 = vpack.c.bf16 %v2524_v45, %v2523_v61  ;;  %vm2510_vm0 = vcmp.eq.s32.totalorder %v2504_v14, 1 }
 0x349   :  { %2552 = vst [vmem:[#allocation10 + $0x28] sm:$0xff] %v2540_v44 }
 0x34a   :  { %2553 = vst [vmem:[#allocation10 + $0x30] sm:$0xff] %v2541_v50 }
 0x34d   :  { %v2443_v43 = vpop.f32.mrf.mxu2  ;;  %v2467_v10 = vpop.f32.mrf.mxu3 }
 0x34e   :  { %v2525_v46 = vsel %vm2508_vm14, %v2443_v43, %v4515_v11  ;;  %v2526_v38 = vsel %vm2508_vm14, %v2467_v10, %v4517_v4  ;;  %v2398_v1 = vpop.f32.mrf.mxu0  ;;  %v2422_v51 = vpop.f32.mrf.mxu1 }
 0x34f   :  { %v2542_v57 = vpack.c.bf16 %v2526_v38, %v2525_v46  ;;  %v2527_v30 = vsel %vm2509_vm15, %v2398_v1, %v4519_v22  ;;  %v2528_v63 = vsel %vm2509_vm15, %v2422_v51, %v4521_v25 }
 0x350   :  { %v2543_v9 = vpack.c.bf16 %v2528_v63, %v2527_v30 }
 0x351   :  { %2554 = vst [vmem:[#allocation10 + $0x38] sm:$0xff] %v2542_v57 }
 0x352   :  { %2555 = vst [vmem:[#allocation10 + $0x40] sm:$0xff] %v2543_v9 }
 0x355   :  { %v2446_v2 = vpop.f32.mrf.mxu2  ;;  %v2470_v59 = vpop.f32.mrf.mxu3 }
 0x356   :  { %v2529_v3 = vsel %vm2509_vm15, %v2446_v2, %v4523_v8  ;;  %v2530_v11 = vsel %vm2509_vm15, %v2470_v59, %v4525_v13  ;;  %v2400_v4 = vpop.f32.mrf.mxu0  ;;  %v2424_v20 = vpop.f32.mrf.mxu1 }
 0x357   :  { %v2544_v29 = vpack.c.bf16 %v2530_v11, %v2529_v3  ;;  %v2531_v22 = vsel %vm2510_vm0, %v2400_v4, %v4527_v15  ;;  %v2532_v25 = vsel %vm2510_vm0, %v2424_v20, %v4529_v33 }
 0x358   :  { %v2545_v21 = vpack.c.bf16 %v2532_v25, %v2531_v22 }
 0x359   :  { %2556 = vst [vmem:[#allocation10 + $0x48] sm:$0xff] %v2544_v29 }
 0x35a   :  { %2557 = vst [vmem:[#allocation10 + $0x50] sm:$0xff] %v2545_v21 }
 0x35d   :  { %v2448_v8 = vpop.f32.mrf.mxu2  ;;  %v2472_v13 = vpop.f32.mrf.mxu3 }
 0x35e   :  { %v2533_v54 = vsel %vm2510_vm0, %v2448_v8, %v4531_v16  ;;  %v2534_v15 = vsel %vm2510_vm0, %v2472_v13, %v4533_v12 }
 0x35f   :  { %v2546_v58 = vpack.c.bf16 %v2534_v15, %v2533_v54 }
 0x361   :  { %2558 = vst [vmem:[#allocation10 + $0x58] sm:$0xff] %v2546_v58 }
 0x362   :  { %2571 = dma.vmem_to_hbm [thread:$0]  %s2564_s24, 1536, %s2566_s4, [#allocation4], %s3829_s15, %s3829_s15, %s3830_s16  }
 0x363   :  { %3825 = dma.done.wait [#allocation4], 1536  }
 0x364   :  { %3826 = vsyncadd [#allocation4], 4294965760 }
 0x365   :  { %2576 = vsyncpa [#allocation3], 1 }
 0x366   :  { %2577 = vsyncpa [#allocation6], 1 }
 0x367   :  { %2578 = vsyncpa [#allocation9], 1 }
 0x368   :  { %2579 = vsyncpa [#allocation4], 1 }

</bundles_post_ra>
